<compile_context>
chip_gen: v7x
topology: tpu7x:2x2x1
jax: 0.10.0
libtpu: 0.0.40
codegen_flags: <defaults>
</compile_context>

<pallas_src>
import jax
import jax.numpy as jnp
from jax import lax
from jax.experimental import pallas as pl
from jax.experimental.pallas import tpu as pltpu

# Small synthetic sizes consistent with the module definition.
VOC_SIZE = 64     # stand-in for len(tokenizer.vocab)
MAX_LEN = 8       # T
EMB_DIM = 100     # E  (emb_dim in the module)
HIDDEN = 50       # H  (LSTM hidden size)
OUT_DIM = 100     # output feature dim
BATCH = 2


def _lstm_block_kernel(x_ref, w_ih_ref, w_hh_ref, b_ref, w_out_ref, b_out_ref,
                       out_ref):
    """x_ref: (T*B, E) bf16 time-major; w_ih_ref: (E, 4H_pad) bf16;
    w_hh_ref: (H, 4H_pad) bf16; b_ref: (1, 4H_pad) f32 (b_ih + b_hh, padded);
    w_out_ref: (T*H, O_pad) bf16; b_out_ref: (1, O_pad) f32;
    out_ref: (B, O_pad) f32."""
    B = out_ref.shape[0]
    H = w_hh_ref.shape[0]
    T = x_ref.shape[0] // B

    # Hoisted, time-invariant input projection + bias: one fused-gate matmul
    # (T*B, E) @ (E, 4H_pad) with f32 accumulation.  Padded gate columns are
    # zero-weight / zero-bias, hence zero, and are never read.
    xw = jnp.dot(x_ref[...], w_ih_ref[...],
                 preferred_element_type=jnp.float32) + b_ref[...]

    w_hh = w_hh_ref[...]                       # (H, 4H_pad) bf16, kept in vregs
    h = jnp.zeros((B, H), jnp.float32)
    c = jnp.zeros((B, H), jnp.float32)
    hs = []
    for t in range(T):                          # static unroll (T = 8)
        # One fused recurrent matmul per step: (B, H) @ (H, 4H_pad).
        gates = xw[t * B:(t + 1) * B, :] + jnp.dot(
            h.astype(jnp.bfloat16), w_hh,
            preferred_element_type=jnp.float32)          # (B, 4H_pad)
        # PyTorch gate order: i, f, g, o (column slices of the fused result).
        i_g = jax.nn.sigmoid(gates[:, 0 * H:1 * H])
        f_g = jax.nn.sigmoid(gates[:, 1 * H:2 * H])
        g_g = jnp.tanh(gates[:, 2 * H:3 * H])
        o_g = jax.nn.sigmoid(gates[:, 3 * H:4 * H])
        c = f_g * c + i_g * g_g                # elementwise math stays f32
        h = o_g * jnp.tanh(c)
        hs.append(h)

    # Deferred flatten + Linear.  concat over t along the last axis gives the
    # row-major (B, T*H) layout of nn.Flatten on a batch_first LSTM output,
    # so a single (B, T*H) @ (T*H, O_pad) matmul == the reference Linear.
    flat = jnp.concatenate(hs, axis=-1).astype(jnp.bfloat16)   # (B, T*H)
    out_ref[...] = (jnp.dot(flat, w_out_ref[...],
                            preferred_element_type=jnp.float32)
                    + b_out_ref[...]).astype(out_ref.dtype)


def _pad_last(a, n):
    """Zero-pad the last dim of `a` up to length n."""
    pad = n - a.shape[-1]
    if pad == 0:
        return a
    cfg = [(0, 0)] * (a.ndim - 1) + [(0, pad)]
    return jnp.pad(a, cfg)


def lstm_block_forward(tokens, params):
    """tokens: (B, T) int32.  Returns (B, OUT_DIM) float32."""
    emb = params["emb"]          # (V, E)
    w_ih = params["w_ih"]        # (4H, E)   PyTorch weight_ih_l0
    w_hh = params["w_hh"]        # (4H, H)   PyTorch weight_hh_l0
    b_ih = params["b_ih"]        # (4H,)
    b_hh = params["b_hh"]        # (4H,)
    w_out = params["w_out"]      # (O, T*H)  PyTorch Linear weight
    b_out = params["b_out"]      # (O,)

    B, T = tokens.shape
    E = emb.shape[1]
    H = w_hh.shape[1]
    O = w_out.shape[0]
    GP = ((4 * H + 127) // 128) * 128    # fused gate width padded to lanes
    OP = ((O + 127) // 128) * 128        # output width padded to lanes

    # Embedding gather (glue, outside the kernel; negligible at these sizes).
    x = jnp.take(emb, tokens, axis=0)                           # (B, T, E)
    x_tm = (jnp.transpose(x, (1, 0, 2))                         # time-major
            .reshape(T * B, E).astype(jnp.bfloat16))            # (T*B, E)

    # Fused-gate weights: (E, 4H) / (H, 4H), columns ordered [i | f | g | o],
    # bf16 MXU inputs, lane-padded to GP.
    w_ih_k = _pad_last(w_ih.T, GP).astype(jnp.bfloat16)         # (E, GP)
    w_hh_k = _pad_last(w_hh.T, GP).astype(jnp.bfloat16)         # (H, GP)
    b_k = _pad_last((b_ih + b_hh).reshape(1, 4 * H), GP)        # (1, GP) f32

    # Output Linear, pre-transposed and lane-padded.
    w_out_k = _pad_last(w_out.T, OP).astype(jnp.bfloat16)       # (T*H, OP)
    b_out_k = _pad_last(b_out.reshape(1, O), OP)                # (1, OP) f32

    vmem = pl.BlockSpec(memory_space=pltpu.MemorySpace.VMEM)
    out_p = pl.pallas_call(
        _lstm_block_kernel,
        out_shape=jax.ShapeDtypeStruct((B, OP), jnp.float32),
        in_specs=[vmem] * 6,
        out_specs=vmem,
    )(x_tm, w_ih_k, w_hh_k, b_k, w_out_k, b_out_k)
    return out_p[:, :O]


def reference_forward(tokens, params):
    """Pure-JAX f32 reference replicating the PyTorch semantics."""
    emb, w_ih, w_hh = params["emb"], params["w_ih"], params["w_hh"]
    b_ih, b_hh = params["b_ih"], params["b_hh"]
    w_out, b_out = params["w_out"], params["b_out"]
    B, T = tokens.shape
    H = w_hh.shape[1]

    x = jnp.take(emb, tokens, axis=0)          # (B, T, E)
    h = jnp.zeros((B, H), jnp.float32)
    c = jnp.zeros((B, H), jnp.float32)
    hs = []
    for t in range(T):
        gates = (jnp.dot(x[:, t], w_ih.T, precision=lax.Precision.HIGHEST)
                 + b_ih
                 + jnp.dot(h, w_hh.T, precision=lax.Precision.HIGHEST)
                 + b_hh)                        # (B, 4H)
        i_g = jax.nn.sigmoid(gates[:, 0 * H:1 * H])
        f_g = jax.nn.sigmoid(gates[:, 1 * H:2 * H])
        g_g = jnp.tanh(gates[:, 2 * H:3 * H])
        o_g = jax.nn.sigmoid(gates[:, 3 * H:4 * H])
        c = f_g * c + i_g * g_g
        h = o_g * jnp.tanh(c)
        hs.append(h)
    flat = jnp.stack(hs, axis=1).reshape(B, T * H)   # Flatten (batch_first)
    return jnp.dot(flat, w_out.T, precision=lax.Precision.HIGHEST) + b_out


def init_params(key):
    ks = jax.random.split(key, 7)
    s_lstm = 1.0 / jnp.sqrt(HIDDEN)
    s_out = 1.0 / jnp.sqrt(HIDDEN * MAX_LEN)
    return {
        "emb": jax.random.normal(ks[0], (VOC_SIZE, EMB_DIM), jnp.float32),
        "w_ih": jax.random.uniform(ks[1], (4 * HIDDEN, EMB_DIM), jnp.float32,
                                   -s_lstm, s_lstm),
        "w_hh": jax.random.uniform(ks[2], (4 * HIDDEN, HIDDEN), jnp.float32,
                                   -s_lstm, s_lstm),
        "b_ih": jax.random.uniform(ks[3], (4 * HIDDEN,), jnp.float32,
                                   -s_lstm, s_lstm),
        "b_hh": jax.random.uniform(ks[4], (4 * HIDDEN,), jnp.float32,
                                   -s_lstm, s_lstm),
        "w_out": jax.random.uniform(ks[5], (OUT_DIM, HIDDEN * MAX_LEN),
                                    jnp.float32, -s_out, s_out),
        "b_out": jax.random.uniform(ks[6], (OUT_DIM,), jnp.float32,
                                    -s_out, s_out),
    }


if __name__ == "__main__":
    key = jax.random.PRNGKey(0)
    pkey, tkey = jax.random.split(key)
    params = init_params(pkey)
    tokens = jax.random.randint(tkey, (BATCH, MAX_LEN), 0, VOC_SIZE, jnp.int32)

    out = jax.block_until_ready(lstm_block_forward(tokens, params))
    ref = jax.block_until_ready(reference_forward(tokens, params))

    assert out.shape == (BATCH, OUT_DIM), out.shape
    # bf16 MXU inputs (f32 accumulation) vs. f32-HIGHEST reference: observed
    # error is ~1e-3..1e-2, so compare with a bf16-appropriate tolerance.
    assert jnp.allclose(out, ref, rtol=3e-2, atol=3e-2), (
        float(jnp.max(jnp.abs(out - ref))))
    print("KERNEL_OK")
</pallas_src>

<mosaic_0001>
module attributes {stable_mosaic.version = 11 : i64} {
  func.func @_lstm_block_kernel(%arg0: memref<16x100xbf16, #tpu.memory_space<vmem>>, %arg1: memref<100x256xbf16, #tpu.memory_space<vmem>>, %arg2: memref<50x256xbf16, #tpu.memory_space<vmem>>, %arg3: memref<1x256xf32, #tpu.memory_space<vmem>>, %arg4: memref<400x128xbf16, #tpu.memory_space<vmem>>, %arg5: memref<1x128xf32, #tpu.memory_space<vmem>>, %arg6: memref<2x128xf32, #tpu.memory_space<vmem>>) attributes {dimension_semantics = [], scalar_prefetch = 0 : i64, scratch_operands = 0 : i64, tpu.core_type = #tpu.core_type<tc>} {
    %c0 = arith.constant 0 : index
    %c0_0 = arith.constant 0 : index
    %0 = vector.load %arg0[%c0, %c0_0] : memref<16x100xbf16, #tpu.memory_space<vmem>>, vector<16x100xbf16>
    %c0_1 = arith.constant 0 : index
    %c0_2 = arith.constant 0 : index
    %1 = vector.load %arg1[%c0_1, %c0_2] : memref<100x256xbf16, #tpu.memory_space<vmem>>, vector<100x256xbf16>
    %cst = arith.constant dense<0.000000e+00> : vector<16x256xf32>
    %2 = tpu.matmul %0, %1, %cst {dimension_numbers = #tpu.dot_dimension_numbers<[1], [0], [0], [1], [0, 0, 1, 1], [], []>} : vector<16x100xbf16>, vector<100x256xbf16>, vector<16x256xf32> -> vector<16x256xf32>
    %c0_3 = arith.constant 0 : index
    %c0_4 = arith.constant 0 : index
    %3 = vector.load %arg3[%c0_3, %c0_4] : memref<1x256xf32, #tpu.memory_space<vmem>>, vector<1x256xf32>
    %4 = vector.broadcast %3 : vector<1x256xf32> to vector<16x256xf32>
    %5 = arith.addf %2, %4 : vector<16x256xf32>
    %c0_5 = arith.constant 0 : index
    %c0_6 = arith.constant 0 : index
    %6 = vector.load %arg2[%c0_5, %c0_6] : memref<50x256xbf16, #tpu.memory_space<vmem>>, vector<50x256xbf16>
    %cst_7 = arith.constant 0.000000e+00 : f32
    %7 = vector.broadcast %cst_7 : f32 to vector<2x50xf32>
    %cst_8 = arith.constant 0.000000e+00 : f32
    %8 = vector.broadcast %cst_8 : f32 to vector<2x50xf32>
    %9 = vector.extract_strided_slice %5 {offsets = [0, 0], sizes = [2, 256], strides = [1, 1]} : vector<16x256xf32> to vector<2x256xf32>
    %10 = arith.truncf %7 : vector<2x50xf32> to vector<2x50xbf16>
    %cst_9 = arith.constant dense<0.000000e+00> : vector<2x256xf32>
    %11 = tpu.matmul %10, %6, %cst_9 {dimension_numbers = #tpu.dot_dimension_numbers<[1], [0], [0], [1], [0, 0, 1, 1], [], []>} : vector<2x50xbf16>, vector<50x256xbf16>, vector<2x256xf32> -> vector<2x256xf32>
    %12 = arith.addf %9, %11 : vector<2x256xf32>
    %13 = vector.extract_strided_slice %12 {offsets = [0, 0], sizes = [2, 50], strides = [1, 1]} : vector<2x256xf32> to vector<2x50xf32>
    %14 = arith.negf %13 : vector<2x50xf32>
    %15 = math.exp %14 : vector<2x50xf32>
    %cst_10 = arith.constant 1.000000e+00 : f32
    %16 = vector.broadcast %cst_10 : f32 to vector<2x50xf32>
    %17 = arith.addf %16, %15 : vector<2x50xf32>
    %18 = arith.divf %16, %17 : vector<2x50xf32>
    %19 = vector.extract_strided_slice %12 {offsets = [0, 50], sizes = [2, 50], strides = [1, 1]} : vector<2x256xf32> to vector<2x50xf32>
    %20 = arith.negf %19 : vector<2x50xf32>
    %21 = math.exp %20 : vector<2x50xf32>
    %cst_11 = arith.constant 1.000000e+00 : f32
    %22 = vector.broadcast %cst_11 : f32 to vector<2x50xf32>
    %23 = arith.addf %22, %21 : vector<2x50xf32>
    %24 = arith.divf %22, %23 : vector<2x50xf32>
    %25 = vector.extract_strided_slice %12 {offsets = [0, 100], sizes = [2, 50], strides = [1, 1]} : vector<2x256xf32> to vector<2x50xf32>
    %26 = math.tanh %25 : vector<2x50xf32>
    %27 = vector.extract_strided_slice %12 {offsets = [0, 150], sizes = [2, 50], strides = [1, 1]} : vector<2x256xf32> to vector<2x50xf32>
    %28 = arith.negf %27 : vector<2x50xf32>
    %29 = math.exp %28 : vector<2x50xf32>
    %cst_12 = arith.constant 1.000000e+00 : f32
    %30 = vector.broadcast %cst_12 : f32 to vector<2x50xf32>
    %31 = arith.addf %30, %29 : vector<2x50xf32>
    %32 = arith.divf %30, %31 : vector<2x50xf32>
    %33 = arith.mulf %24, %8 : vector<2x50xf32>
    %34 = arith.mulf %18, %26 : vector<2x50xf32>
    %35 = arith.addf %33, %34 : vector<2x50xf32>
    %36 = math.tanh %35 : vector<2x50xf32>
    %37 = arith.mulf %32, %36 : vector<2x50xf32>
    %38 = vector.extract_strided_slice %5 {offsets = [2, 0], sizes = [2, 256], strides = [1, 1]} : vector<16x256xf32> to vector<2x256xf32>
    %39 = arith.truncf %37 : vector<2x50xf32> to vector<2x50xbf16>
    %cst_13 = arith.constant dense<0.000000e+00> : vector<2x256xf32>
    %40 = tpu.matmul %39, %6, %cst_13 {dimension_numbers = #tpu.dot_dimension_numbers<[1], [0], [0], [1], [0, 0, 1, 1], [], []>} : vector<2x50xbf16>, vector<50x256xbf16>, vector<2x256xf32> -> vector<2x256xf32>
    %41 = arith.addf %38, %40 : vector<2x256xf32>
    %42 = vector.extract_strided_slice %41 {offsets = [0, 0], sizes = [2, 50], strides = [1, 1]} : vector<2x256xf32> to vector<2x50xf32>
    %43 = arith.negf %42 : vector<2x50xf32>
    %44 = math.exp %43 : vector<2x50xf32>
    %cst_14 = arith.constant 1.000000e+00 : f32
    %45 = vector.broadcast %cst_14 : f32 to vector<2x50xf32>
    %46 = arith.addf %45, %44 : vector<2x50xf32>
    %47 = arith.divf %45, %46 : vector<2x50xf32>
    %48 = vector.extract_strided_slice %41 {offsets = [0, 50], sizes = [2, 50], strides = [1, 1]} : vector<2x256xf32> to vector<2x50xf32>
    %49 = arith.negf %48 : vector<2x50xf32>
    %50 = math.exp %49 : vector<2x50xf32>
    %cst_15 = arith.constant 1.000000e+00 : f32
    %51 = vector.broadcast %cst_15 : f32 to vector<2x50xf32>
    %52 = arith.addf %51, %50 : vector<2x50xf32>
    %53 = arith.divf %51, %52 : vector<2x50xf32>
    %54 = vector.extract_strided_slice %41 {offsets = [0, 100], sizes = [2, 50], strides = [1, 1]} : vector<2x256xf32> to vector<2x50xf32>
    %55 = math.tanh %54 : vector<2x50xf32>
    %56 = vector.extract_strided_slice %41 {offsets = [0, 150], sizes = [2, 50], strides = [1, 1]} : vector<2x256xf32> to vector<2x50xf32>
    %57 = arith.negf %56 : vector<2x50xf32>
    %58 = math.exp %57 : vector<2x50xf32>
    %cst_16 = arith.constant 1.000000e+00 : f32
    %59 = vector.broadcast %cst_16 : f32 to vector<2x50xf32>
    %60 = arith.addf %59, %58 : vector<2x50xf32>
    %61 = arith.divf %59, %60 : vector<2x50xf32>
    %62 = arith.mulf %53, %35 : vector<2x50xf32>
    %63 = arith.mulf %47, %55 : vector<2x50xf32>
    %64 = arith.addf %62, %63 : vector<2x50xf32>
    %65 = math.tanh %64 : vector<2x50xf32>
    %66 = arith.mulf %61, %65 : vector<2x50xf32>
    %67 = vector.extract_strided_slice %5 {offsets = [4, 0], sizes = [2, 256], strides = [1, 1]} : vector<16x256xf32> to vector<2x256xf32>
    %68 = arith.truncf %66 : vector<2x50xf32> to vector<2x50xbf16>
    %cst_17 = arith.constant dense<0.000000e+00> : vector<2x256xf32>
    %69 = tpu.matmul %68, %6, %cst_17 {dimension_numbers = #tpu.dot_dimension_numbers<[1], [0], [0], [1], [0, 0, 1, 1], [], []>} : vector<2x50xbf16>, vector<50x256xbf16>, vector<2x256xf32> -> vector<2x256xf32>
    %70 = arith.addf %67, %69 : vector<2x256xf32>
    %71 = vector.extract_strided_slice %70 {offsets = [0, 0], sizes = [2, 50], strides = [1, 1]} : vector<2x256xf32> to vector<2x50xf32>
    %72 = arith.negf %71 : vector<2x50xf32>
    %73 = math.exp %72 : vector<2x50xf32>
    %cst_18 = arith.constant 1.000000e+00 : f32
    %74 = vector.broadcast %cst_18 : f32 to vector<2x50xf32>
    %75 = arith.addf %74, %73 : vector<2x50xf32>
    %76 = arith.divf %74, %75 : vector<2x50xf32>
    %77 = vector.extract_strided_slice %70 {offsets = [0, 50], sizes = [2, 50], strides = [1, 1]} : vector<2x256xf32> to vector<2x50xf32>
    %78 = arith.negf %77 : vector<2x50xf32>
    %79 = math.exp %78 : vector<2x50xf32>
    %cst_19 = arith.constant 1.000000e+00 : f32
    %80 = vector.broadcast %cst_19 : f32 to vector<2x50xf32>
    %81 = arith.addf %80, %79 : vector<2x50xf32>
    %82 = arith.divf %80, %81 : vector<2x50xf32>
    %83 = vector.extract_strided_slice %70 {offsets = [0, 100], sizes = [2, 50], strides = [1, 1]} : vector<2x256xf32> to vector<2x50xf32>
    %84 = math.tanh %83 : vector<2x50xf32>
    %85 = vector.extract_strided_slice %70 {offsets = [0, 150], sizes = [2, 50], strides = [1, 1]} : vector<2x256xf32> to vector<2x50xf32>
    %86 = arith.negf %85 : vector<2x50xf32>
    %87 = math.exp %86 : vector<2x50xf32>
    %cst_20 = arith.constant 1.000000e+00 : f32
    %88 = vector.broadcast %cst_20 : f32 to vector<2x50xf32>
    %89 = arith.addf %88, %87 : vector<2x50xf32>
    %90 = arith.divf %88, %89 : vector<2x50xf32>
    %91 = arith.mulf %82, %64 : vector<2x50xf32>
    %92 = arith.mulf %76, %84 : vector<2x50xf32>
    %93 = arith.addf %91, %92 : vector<2x50xf32>
    %94 = math.tanh %93 : vector<2x50xf32>
    %95 = arith.mulf %90, %94 : vector<2x50xf32>
    %96 = vector.extract_strided_slice %5 {offsets = [6, 0], sizes = [2, 256], strides = [1, 1]} : vector<16x256xf32> to vector<2x256xf32>
    %97 = arith.truncf %95 : vector<2x50xf32> to vector<2x50xbf16>
    %cst_21 = arith.constant dense<0.000000e+00> : vector<2x256xf32>
    %98 = tpu.matmul %97, %6, %cst_21 {dimension_numbers = #tpu.dot_dimension_numbers<[1], [0], [0], [1], [0, 0, 1, 1], [], []>} : vector<2x50xbf16>, vector<50x256xbf16>, vector<2x256xf32> -> vector<2x256xf32>
    %99 = arith.addf %96, %98 : vector<2x256xf32>
    %100 = vector.extract_strided_slice %99 {offsets = [0, 0], sizes = [2, 50], strides = [1, 1]} : vector<2x256xf32> to vector<2x50xf32>
    %101 = arith.negf %100 : vector<2x50xf32>
    %102 = math.exp %101 : vector<2x50xf32>
    %cst_22 = arith.constant 1.000000e+00 : f32
    %103 = vector.broadcast %cst_22 : f32 to vector<2x50xf32>
    %104 = arith.addf %103, %102 : vector<2x50xf32>
    %105 = arith.divf %103, %104 : vector<2x50xf32>
    %106 = vector.extract_strided_slice %99 {offsets = [0, 50], sizes = [2, 50], strides = [1, 1]} : vector<2x256xf32> to vector<2x50xf32>
    %107 = arith.negf %106 : vector<2x50xf32>
    %108 = math.exp %107 : vector<2x50xf32>
    %cst_23 = arith.constant 1.000000e+00 : f32
    %109 = vector.broadcast %cst_23 : f32 to vector<2x50xf32>
    %110 = arith.addf %109, %108 : vector<2x50xf32>
    %111 = arith.divf %109, %110 : vector<2x50xf32>
    %112 = vector.extract_strided_slice %99 {offsets = [0, 100], sizes = [2, 50], strides = [1, 1]} : vector<2x256xf32> to vector<2x50xf32>
    %113 = math.tanh %112 : vector<2x50xf32>
    %114 = vector.extract_strided_slice %99 {offsets = [0, 150], sizes = [2, 50], strides = [1, 1]} : vector<2x256xf32> to vector<2x50xf32>
    %115 = arith.negf %114 : vector<2x50xf32>
    %116 = math.exp %115 : vector<2x50xf32>
    %cst_24 = arith.constant 1.000000e+00 : f32
    %117 = vector.broadcast %cst_24 : f32 to vector<2x50xf32>
    %118 = arith.addf %117, %116 : vector<2x50xf32>
    %119 = arith.divf %117, %118 : vector<2x50xf32>
    %120 = arith.mulf %111, %93 : vector<2x50xf32>
    %121 = arith.mulf %105, %113 : vector<2x50xf32>
    %122 = arith.addf %120, %121 : vector<2x50xf32>
    %123 = math.tanh %122 : vector<2x50xf32>
    %124 = arith.mulf %119, %123 : vector<2x50xf32>
    %125 = vector.extract_strided_slice %5 {offsets = [8, 0], sizes = [2, 256], strides = [1, 1]} : vector<16x256xf32> to vector<2x256xf32>
    %126 = arith.truncf %124 : vector<2x50xf32> to vector<2x50xbf16>
    %cst_25 = arith.constant dense<0.000000e+00> : vector<2x256xf32>
    %127 = tpu.matmul %126, %6, %cst_25 {dimension_numbers = #tpu.dot_dimension_numbers<[1], [0], [0], [1], [0, 0, 1, 1], [], []>} : vector<2x50xbf16>, vector<50x256xbf16>, vector<2x256xf32> -> vector<2x256xf32>
    %128 = arith.addf %125, %127 : vector<2x256xf32>
    %129 = vector.extract_strided_slice %128 {offsets = [0, 0], sizes = [2, 50], strides = [1, 1]} : vector<2x256xf32> to vector<2x50xf32>
    %130 = arith.negf %129 : vector<2x50xf32>
    %131 = math.exp %130 : vector<2x50xf32>
    %cst_26 = arith.constant 1.000000e+00 : f32
    %132 = vector.broadcast %cst_26 : f32 to vector<2x50xf32>
    %133 = arith.addf %132, %131 : vector<2x50xf32>
    %134 = arith.divf %132, %133 : vector<2x50xf32>
    %135 = vector.extract_strided_slice %128 {offsets = [0, 50], sizes = [2, 50], strides = [1, 1]} : vector<2x256xf32> to vector<2x50xf32>
    %136 = arith.negf %135 : vector<2x50xf32>
    %137 = math.exp %136 : vector<2x50xf32>
    %cst_27 = arith.constant 1.000000e+00 : f32
    %138 = vector.broadcast %cst_27 : f32 to vector<2x50xf32>
    %139 = arith.addf %138, %137 : vector<2x50xf32>
    %140 = arith.divf %138, %139 : vector<2x50xf32>
    %141 = vector.extract_strided_slice %128 {offsets = [0, 100], sizes = [2, 50], strides = [1, 1]} : vector<2x256xf32> to vector<2x50xf32>
    %142 = math.tanh %141 : vector<2x50xf32>
    %143 = vector.extract_strided_slice %128 {offsets = [0, 150], sizes = [2, 50], strides = [1, 1]} : vector<2x256xf32> to vector<2x50xf32>
    %144 = arith.negf %143 : vector<2x50xf32>
    %145 = math.exp %144 : vector<2x50xf32>
    %cst_28 = arith.constant 1.000000e+00 : f32
    %146 = vector.broadcast %cst_28 : f32 to vector<2x50xf32>
    %147 = arith.addf %146, %145 : vector<2x50xf32>
    %148 = arith.divf %146, %147 : vector<2x50xf32>
    %149 = arith.mulf %140, %122 : vector<2x50xf32>
    %150 = arith.mulf %134, %142 : vector<2x50xf32>
    %151 = arith.addf %149, %150 : vector<2x50xf32>
    %152 = math.tanh %151 : vector<2x50xf32>
    %153 = arith.mulf %148, %152 : vector<2x50xf32>
    %154 = vector.extract_strided_slice %5 {offsets = [10, 0], sizes = [2, 256], strides = [1, 1]} : vector<16x256xf32> to vector<2x256xf32>
    %155 = arith.truncf %153 : vector<2x50xf32> to vector<2x50xbf16>
    %cst_29 = arith.constant dense<0.000000e+00> : vector<2x256xf32>
    %156 = tpu.matmul %155, %6, %cst_29 {dimension_numbers = #tpu.dot_dimension_numbers<[1], [0], [0], [1], [0, 0, 1, 1], [], []>} : vector<2x50xbf16>, vector<50x256xbf16>, vector<2x256xf32> -> vector<2x256xf32>
    %157 = arith.addf %154, %156 : vector<2x256xf32>
    %158 = vector.extract_strided_slice %157 {offsets = [0, 0], sizes = [2, 50], strides = [1, 1]} : vector<2x256xf32> to vector<2x50xf32>
    %159 = arith.negf %158 : vector<2x50xf32>
    %160 = math.exp %159 : vector<2x50xf32>
    %cst_30 = arith.constant 1.000000e+00 : f32
    %161 = vector.broadcast %cst_30 : f32 to vector<2x50xf32>
    %162 = arith.addf %161, %160 : vector<2x50xf32>
    %163 = arith.divf %161, %162 : vector<2x50xf32>
    %164 = vector.extract_strided_slice %157 {offsets = [0, 50], sizes = [2, 50], strides = [1, 1]} : vector<2x256xf32> to vector<2x50xf32>
    %165 = arith.negf %164 : vector<2x50xf32>
    %166 = math.exp %165 : vector<2x50xf32>
    %cst_31 = arith.constant 1.000000e+00 : f32
    %167 = vector.broadcast %cst_31 : f32 to vector<2x50xf32>
    %168 = arith.addf %167, %166 : vector<2x50xf32>
    %169 = arith.divf %167, %168 : vector<2x50xf32>
    %170 = vector.extract_strided_slice %157 {offsets = [0, 100], sizes = [2, 50], strides = [1, 1]} : vector<2x256xf32> to vector<2x50xf32>
    %171 = math.tanh %170 : vector<2x50xf32>
    %172 = vector.extract_strided_slice %157 {offsets = [0, 150], sizes = [2, 50], strides = [1, 1]} : vector<2x256xf32> to vector<2x50xf32>
    %173 = arith.negf %172 : vector<2x50xf32>
    %174 = math.exp %173 : vector<2x50xf32>
    %cst_32 = arith.constant 1.000000e+00 : f32
    %175 = vector.broadcast %cst_32 : f32 to vector<2x50xf32>
    %176 = arith.addf %175, %174 : vector<2x50xf32>
    %177 = arith.divf %175, %176 : vector<2x50xf32>
    %178 = arith.mulf %169, %151 : vector<2x50xf32>
    %179 = arith.mulf %163, %171 : vector<2x50xf32>
    %180 = arith.addf %178, %179 : vector<2x50xf32>
    %181 = math.tanh %180 : vector<2x50xf32>
    %182 = arith.mulf %177, %181 : vector<2x50xf32>
    %183 = vector.extract_strided_slice %5 {offsets = [12, 0], sizes = [2, 256], strides = [1, 1]} : vector<16x256xf32> to vector<2x256xf32>
    %184 = arith.truncf %182 : vector<2x50xf32> to vector<2x50xbf16>
    %cst_33 = arith.constant dense<0.000000e+00> : vector<2x256xf32>
    %185 = tpu.matmul %184, %6, %cst_33 {dimension_numbers = #tpu.dot_dimension_numbers<[1], [0], [0], [1], [0, 0, 1, 1], [], []>} : vector<2x50xbf16>, vector<50x256xbf16>, vector<2x256xf32> -> vector<2x256xf32>
    %186 = arith.addf %183, %185 : vector<2x256xf32>
    %187 = vector.extract_strided_slice %186 {offsets = [0, 0], sizes = [2, 50], strides = [1, 1]} : vector<2x256xf32> to vector<2x50xf32>
    %188 = arith.negf %187 : vector<2x50xf32>
    %189 = math.exp %188 : vector<2x50xf32>
    %cst_34 = arith.constant 1.000000e+00 : f32
    %190 = vector.broadcast %cst_34 : f32 to vector<2x50xf32>
    %191 = arith.addf %190, %189 : vector<2x50xf32>
    %192 = arith.divf %190, %191 : vector<2x50xf32>
    %193 = vector.extract_strided_slice %186 {offsets = [0, 50], sizes = [2, 50], strides = [1, 1]} : vector<2x256xf32> to vector<2x50xf32>
    %194 = arith.negf %193 : vector<2x50xf32>
    %195 = math.exp %194 : vector<2x50xf32>
    %cst_35 = arith.constant 1.000000e+00 : f32
    %196 = vector.broadcast %cst_35 : f32 to vector<2x50xf32>
    %197 = arith.addf %196, %195 : vector<2x50xf32>
    %198 = arith.divf %196, %197 : vector<2x50xf32>
    %199 = vector.extract_strided_slice %186 {offsets = [0, 100], sizes = [2, 50], strides = [1, 1]} : vector<2x256xf32> to vector<2x50xf32>
    %200 = math.tanh %199 : vector<2x50xf32>
    %201 = vector.extract_strided_slice %186 {offsets = [0, 150], sizes = [2, 50], strides = [1, 1]} : vector<2x256xf32> to vector<2x50xf32>
    %202 = arith.negf %201 : vector<2x50xf32>
    %203 = math.exp %202 : vector<2x50xf32>
    %cst_36 = arith.constant 1.000000e+00 : f32
    %204 = vector.broadcast %cst_36 : f32 to vector<2x50xf32>
    %205 = arith.addf %204, %203 : vector<2x50xf32>
    %206 = arith.divf %204, %205 : vector<2x50xf32>
    %207 = arith.mulf %198, %180 : vector<2x50xf32>
    %208 = arith.mulf %192, %200 : vector<2x50xf32>
    %209 = arith.addf %207, %208 : vector<2x50xf32>
    %210 = math.tanh %209 : vector<2x50xf32>
    %211 = arith.mulf %206, %210 : vector<2x50xf32>
    %212 = vector.extract_strided_slice %5 {offsets = [14, 0], sizes = [2, 256], strides = [1, 1]} : vector<16x256xf32> to vector<2x256xf32>
    %213 = arith.truncf %211 : vector<2x50xf32> to vector<2x50xbf16>
    %cst_37 = arith.constant dense<0.000000e+00> : vector<2x256xf32>
    %214 = tpu.matmul %213, %6, %cst_37 {dimension_numbers = #tpu.dot_dimension_numbers<[1], [0], [0], [1], [0, 0, 1, 1], [], []>} : vector<2x50xbf16>, vector<50x256xbf16>, vector<2x256xf32> -> vector<2x256xf32>
    %215 = arith.addf %212, %214 : vector<2x256xf32>
    %216 = vector.extract_strided_slice %215 {offsets = [0, 0], sizes = [2, 50], strides = [1, 1]} : vector<2x256xf32> to vector<2x50xf32>
    %217 = arith.negf %216 : vector<2x50xf32>
    %218 = math.exp %217 : vector<2x50xf32>
    %cst_38 = arith.constant 1.000000e+00 : f32
    %219 = vector.broadcast %cst_38 : f32 to vector<2x50xf32>
    %220 = arith.addf %219, %218 : vector<2x50xf32>
    %221 = arith.divf %219, %220 : vector<2x50xf32>
    %222 = vector.extract_strided_slice %215 {offsets = [0, 50], sizes = [2, 50], strides = [1, 1]} : vector<2x256xf32> to vector<2x50xf32>
    %223 = arith.negf %222 : vector<2x50xf32>
    %224 = math.exp %223 : vector<2x50xf32>
    %cst_39 = arith.constant 1.000000e+00 : f32
    %225 = vector.broadcast %cst_39 : f32 to vector<2x50xf32>
    %226 = arith.addf %225, %224 : vector<2x50xf32>
    %227 = arith.divf %225, %226 : vector<2x50xf32>
    %228 = vector.extract_strided_slice %215 {offsets = [0, 100], sizes = [2, 50], strides = [1, 1]} : vector<2x256xf32> to vector<2x50xf32>
    %229 = math.tanh %228 : vector<2x50xf32>
    %230 = vector.extract_strided_slice %215 {offsets = [0, 150], sizes = [2, 50], strides = [1, 1]} : vector<2x256xf32> to vector<2x50xf32>
    %231 = arith.negf %230 : vector<2x50xf32>
    %232 = math.exp %231 : vector<2x50xf32>
    %cst_40 = arith.constant 1.000000e+00 : f32
    %233 = vector.broadcast %cst_40 : f32 to vector<2x50xf32>
    %234 = arith.addf %233, %232 : vector<2x50xf32>
    %235 = arith.divf %233, %234 : vector<2x50xf32>
    %236 = arith.mulf %227, %209 : vector<2x50xf32>
    %237 = arith.mulf %221, %229 : vector<2x50xf32>
    %238 = arith.addf %236, %237 : vector<2x50xf32>
    %239 = math.tanh %238 : vector<2x50xf32>
    %240 = arith.mulf %235, %239 : vector<2x50xf32>
    %241 = tpu.concatenate %37, %66, %95, %124, %153, %182, %211, %240 in 1 : vector<2x50xf32>, vector<2x50xf32>, vector<2x50xf32>, vector<2x50xf32>, vector<2x50xf32>, vector<2x50xf32>, vector<2x50xf32>, vector<2x50xf32> -> vector<2x400xf32>
    %242 = arith.truncf %241 : vector<2x400xf32> to vector<2x400xbf16>
    %c0_41 = arith.constant 0 : index
    %c0_42 = arith.constant 0 : index
    %243 = vector.load %arg4[%c0_41, %c0_42] : memref<400x128xbf16, #tpu.memory_space<vmem>>, vector<400x128xbf16>
    %cst_43 = arith.constant dense<0.000000e+00> : vector<2x128xf32>
    %244 = tpu.matmul %242, %243, %cst_43 {dimension_numbers = #tpu.dot_dimension_numbers<[1], [0], [0], [1], [0, 0, 1, 1], [], []>} : vector<2x400xbf16>, vector<400x128xbf16>, vector<2x128xf32> -> vector<2x128xf32>
    %c0_44 = arith.constant 0 : index
    %c0_45 = arith.constant 0 : index
    %245 = vector.load %arg5[%c0_44, %c0_45] : memref<1x128xf32, #tpu.memory_space<vmem>>, vector<1x128xf32>
    %246 = vector.broadcast %245 : vector<1x128xf32> to vector<2x128xf32>
    %247 = arith.addf %244, %246 : vector<2x128xf32>
    %c0_46 = arith.constant 0 : index
    %c0_47 = arith.constant 0 : index
    %248 = vector.load %arg6[%c0_46, %c0_47] : memref<2x128xf32, #tpu.memory_space<vmem>>, vector<2x128xf32>
    tpu.vector_store %arg6[%c0_46, %c0_47], %247 {strides = array<i32>} : memref<2x128xf32, #tpu.memory_space<vmem>>, vector<2x128xf32>,
    return
  }
}

</mosaic_0001>

<bundles_post_ra>
// kernel: tpu_custom_call.1
= control target key start
LH: loop header
LB: loop body
LE: loop exit
PB: predicated region body
PF: predicated region fallthrough
CT: control target
= control target key end

     0   :  { %11 = vsyncpa [#allocation3], 0  ;;  %s2165_s0 = inlined_call_operand.hbm [shape: bf16[16,100], index: 0, kind: input, shape index: {}]   ;;  %s2166_s1 = inlined_call_operand.hbm [shape: bf16[100,256], index: 1, kind: input, shape index: {}]   ;;  %s2167_s2 = inlined_call_operand.hbm [shape: bf16[50,256], index: 2, kind: input, shape index: {}]   ;;  %s2168_s3 = inlined_call_operand.vmem [shape: f32[1,256], index: 3, kind: input, shape index: {}]   ;;  %s2169_s4 = inlined_call_operand.hbm [shape: bf16[400,128], index: 4, kind: input, shape index: {}]   ;;  %s2170_s5 = inlined_call_operand.vmem [shape: f32[1,128], index: 5, kind: input, shape index: {}]   ;;  %s2171_s6 = inlined_call_operand.hbm [shape: f32[2,128], index: 6, kind: output, shape index: {}]  }
   0x1   :  { %12 = vsyncpa [#allocation6], 0 }
   0x2   :  { %13 = vsyncpa [#allocation9], 0 }
   0x3   :  { %14 = vsyncpa [#allocation4], 0  ;;  %s1790_s21 = smov [#allocation5]   ;;  %s1672_s25 = scalar_lea.hbm %s2166_s1, 1664 }
   0x4   :  { %s32_s22 = sshll.u32 %s1790_s21, 4  ;;  %p1673_p0 = scmp.ne.s32.totalorder %s2166_s1, %s1672_s25  ;;  %s33_s22 = int_to_ptr.vmem [resolvable:$true] %s32_s22 }
   0x5   :  { %p1676_p1 = scmp.lt.u32.totalorder %s1672_s25, %s2166_s1 }
   0x7   :  { %p1678_p2 = pnand %p1676_p1, %p1673_p0 }
   0x9   :  { %1681 = shalt.err (!%p1678_p2)
}
   0xa   :  { %s1682_s30 = scalar_lea.vmem %s33_s22, 1664  ;;  %p1687_p4 = scmp.lt.s32.totalorder %s33_s22, %s33_s22 }
   0xb   :  { %p1683_p3 = scmp.ne.s32.totalorder %s33_s22, %s1682_s30  ;;  %p1688_p5 = scmp.lt.s32.totalorder %s1682_s30, %s1682_s30 }
   0xd   :  { %p1689_p6 = por %p1688_p5, %p1687_p4 }
   0xf   :  { %p1690_p7 = pnand %p1689_p6, %p1683_p3 }
  0x11   :  { %1693 = shalt.err (!%p1690_p7)
}
  0x12   :  { %s1791_s7 = smov 128   ;;  %s1792_s8 = smov 8  }
  0x13   :  { %38 = dma.hbm_to_vmem [thread:$0]  %s2166_s1, 1664, %s33_s22, [#allocation6], %s1791_s7, %s1791_s7, %s1792_s8  }
  0x14   :  { %s1793_s11 = smov [#allocation2]   ;;  %s1694_s15 = scalar_lea.hbm %s2165_s0, 128 }
  0x15   :  { %s20_s12 = sshll.u32 %s1793_s11, 4  ;;  %p1695_p8 = scmp.ne.s32.totalorder %s2165_s0, %s1694_s15  ;;  %s21_s12 = int_to_ptr.vmem [resolvable:$true] %s20_s12 }
  0x16   :  { %p1698_p9 = scmp.lt.u32.totalorder %s1694_s15, %s2165_s0 }
  0x18   :  { %p1700_p10 = pnand %p1698_p9, %p1695_p8 }
  0x1a   :  { %1703 = shalt.err (!%p1700_p10)
}
  0x1b   :  { %s1704_s20 = scalar_lea.vmem %s21_s12, 128  ;;  %p1709_p12 = scmp.lt.s32.totalorder %s21_s12, %s21_s12 }
  0x1c   :  { %p1705_p11 = scmp.ne.s32.totalorder %s21_s12, %s1704_s20  ;;  %p1710_p13 = scmp.lt.s32.totalorder %s1704_s20, %s1704_s20 }
  0x1e   :  { %p1711_p0 = por %p1710_p13, %p1709_p12 }
  0x20   :  { %p1712_p1 = pnand %p1711_p0, %p1705_p11 }
  0x22   :  { %1715 = shalt.err (!%p1712_p1)
}
  0x23   :  { %s1794_s1 = smov 64   ;;  %s1795_s21 = smov 4  }
  0x24   :  { %26 = dma.hbm_to_vmem [thread:$0]  %s2165_s0, 128, %s21_s12, [#allocation3], %s1794_s1, %s1794_s1, %s1795_s21  }
  0x25   :  { %s1796_s24 = smov [#allocation7]   ;;  %s1797_s26 = smov [#allocation8]  }
  0x26   :  { %s44_s25 = sshll.u32 %s1796_s24, 4  ;;  %s58_s27 = sshll.u32 %s1797_s26, 4  ;;  %s45_s25 = int_to_ptr.vmem [resolvable:$true] %s44_s25  ;;  %s1872_s27 = int_to_ptr.vmem [resolvable:$true] %s58_s27 }
  0x27   :  { %s1716_s30 = scalar_lea.hbm %s2167_s2, 896 }
  0x28   :  { %p1717_p2 = scmp.ne.s32.totalorder %s2167_s2, %s1716_s30  ;;  %p1720_p3 = scmp.lt.u32.totalorder %s1716_s30, %s2167_s2 }
  0x2a   :  { %p1722_p4 = pnand %p1720_p3, %p1717_p2 }
  0x2c   :  { %1725 = shalt.err (!%p1722_p4)
}
  0x2d   :  { %s1726_s0 = scalar_lea.vmem %s45_s25, 896  ;;  %p1731_p6 = scmp.lt.s32.totalorder %s45_s25, %s45_s25 }
  0x2e   :  { %p1727_p5 = scmp.ne.s32.totalorder %s45_s25, %s1726_s0  ;;  %p1732_p7 = scmp.lt.s32.totalorder %s1726_s0, %s1726_s0 }
  0x30   :  { %p1733_p8 = por %p1732_p7, %p1731_p6 }
  0x32   :  { %p1734_p9 = pnand %p1733_p8, %p1727_p5 }
  0x34   :  { %1737 = shalt.err (!%p1734_p9)
}
  0x35   :  { %50 = dma.hbm_to_vmem [thread:$0]  %s2167_s2, 896, %s45_s25, [#allocation6], %s1791_s7, %s1791_s7, %s1792_s8  }
  0x36   :  { %s1738_s17 = scalar_lea.hbm %s2169_s4, 3200 }
  0x37   :  { %p1739_p10 = scmp.ne.s32.totalorder %s2169_s4, %s1738_s17  ;;  %p1742_p11 = scmp.lt.u32.totalorder %s1738_s17, %s2169_s4 }
  0x39   :  { %p1744_p12 = pnand %p1742_p11, %p1739_p10 }
  0x3b   :  { %1747 = shalt.err (!%p1744_p12)
}
  0x3c   :  { %s1748_s23 = scalar_lea.vmem %s1872_s27, 3200  ;;  %p1753_p0 = scmp.lt.s32.totalorder %s1872_s27, %s1872_s27 }
  0x3d   :  { %p1749_p13 = scmp.ne.s32.totalorder %s1872_s27, %s1748_s23  ;;  %p1754_p1 = scmp.lt.s32.totalorder %s1748_s23, %s1748_s23 }
  0x3f   :  { %p1755_p2 = por %p1754_p1, %p1753_p0 }
  0x41   :  { %p1756_p3 = pnand %p1755_p2, %p1749_p13 }
  0x43   :  { %1759 = shalt.err (!%p1756_p3)
}
  0x44   :  { %64 = dma.hbm_to_vmem [thread:$0]  %s2169_s4, 3200, %s1872_s27, [#allocation9], %s1794_s1, %s1794_s1, %s1795_s21  }
  0x45   :  { %1782 = dma.done.wait [#allocation3], 128  }
  0x46   :  { %1783 = vsyncadd [#allocation3], 4294967168 }
  0x47   :  { %1784 = dma.done.wait [#allocation6], 2560  }
  0x48   :  { %1785 = vsyncadd [#allocation6], 4294964736 }
  0x49   :  { %1786 = dma.done.wait [#allocation9], 3200  }
  0x4a   :  { %1787 = vsyncadd [#allocation9], 4294964096  ;;  %v1798_v0 = vmov 0   ;;  %v1503_v1 = vld [vmem:[#allocation5 + $0x4] ss:$8 sps:$4 sm:$0xff]   ;;  %vm277_vm0 = vcmask 1040384   ;;  %v97_v28 = vlaneseq }
  0x4b   :  { %316 = vmatprep.mubr.bf16.mxu1 %v1798_v0  ;;  %220 = vmatprep.mubr.bf16.mxu0 %v1798_v0  ;;  %v1505_v2 = vld [vmem:[#allocation5] ss:$8 sps:$4 sm:$0xff]   ;;  %v1506_v3 = vld [vmem:[#allocation5 + $0x14] ss:$8 sps:$4 sm:$0xff]   ;;  %v1508_v4 = vld [vmem:[#allocation5 + $0x10] ss:$8 sps:$4 sm:$0xff]  }
  0x4c   :  { %188 = vmatprep.subr.bf16.mxu0 %v1503_v1  ;;  %v1509_v5 = vld [vmem:[#allocation5 + $0x24] ss:$8 sps:$4 sm:$0xff]   ;;  %v1511_v7 = vld [vmem:[#allocation5 + $0x20] ss:$8 sps:$4 sm:$0xff]   ;;  %v1514_v10 = vld [vmem:[#allocation5 + $0x34] ss:$8 sps:$4 sm:$0xff]  }
  0x4d   :  { %189 = vmatpush1.bf16.msra.mxu0 %v1505_v2  ;;  %v1911_v6 = vld [vmem:[#allocation7 + $0x4] ss:$8 sps:$4 sm:$0xff]   ;;  %v1914_v8 = vld [vmem:[#allocation7] ss:$8 sps:$4 sm:$0xff]   ;;  %v1916_v9 = vld [vmem:[#allocation7 + $0x14] ss:$8 sps:$4 sm:$0xff]  }
  0x4e   :  { %190 = vmatprep.subr.bf16.mxu0 %v1506_v3  ;;  %284 = vmatprep.subr.bf16.mxu1 %v1911_v6  ;;  %v1919_v11 = vld [vmem:[#allocation7 + $0x10] ss:$8 sps:$4 sm:$0xff]   ;;  %v1922_v12 = vld [vmem:[#allocation7 + $0x24] ss:$8 sps:$4 sm:$0xff]   ;;  %vm181_vm1 = vcmask 1041408   ;;  %vm177_vm2 = vcmask 818176  }
  0x4f   :  { %285 = vmatpush1.bf16.msra.mxu1 %v1914_v8  ;;  %v1517_v13 = vld [vmem:[#allocation5 + $0x30] ss:$8 sps:$4 sm:$0xff]   ;;  %v1520_v14 = vld [vmem:[#allocation5 + $0x44] ss:$8 sps:$4 sm:$0xff]   ;;  %v1523_v18 = vld [vmem:[#allocation5 + $0x40] ss:$8 sps:$4 sm:$0xff]  }
  0x50   :  { %286 = vmatprep.subr.bf16.mxu1 %v1916_v9  ;;  %v1924_v15 = vld [vmem:[#allocation7 + $0x20] ss:$8 sps:$4 sm:$0xff]   ;;  %v237_v16 = vld [vmem:[#allocation7 + $0x30] sm:$0x11]  ;;  %v94_v17 = vld [vmem:[#allocation5 + $0x60] sm:$0x33] }
  0x51   :  { %191 = vmatpush1.bf16.msra.mxu0 %v1508_v4  ;;  %v1928_v19 = vcombine.high %v237_v16, %v237_v16  ;;  %v1404_v20 = vcombine.low %v237_v16, %v237_v16  ;;  %v1394_v21 = vcombine.low %v94_v17, %v94_v17  ;;  %v1526_v22 = vld [vmem:[#allocation5 + $0x54] ss:$8 sps:$4 sm:$0xff]   ;;  %v1529_v25 = vld [vmem:[#allocation5 + $0x50] ss:$8 sps:$4 sm:$0xff]   ;;  %v1395_v26 = vcombine.high %v94_v17, %v94_v17  ;;  %s1800_s1 = smov 50   ;;  %s1801_s21 = smov 100  }
  0x52   :  { %192 = vmatprep.subr.bf16.mxu0 %v1509_v5  ;;  %v1534_v27 = vld [vmem:[#allocation2] sm:$0xff]   ;;  %v98_v29 = vshrl.u32 %v97_v28, 7  ;;  %vm348_vm3 = vcmask 228352   ;;  %s1802_s24 = smov 106   ;;  %vm273_vm4 = vcmask 408576   ;;  %s1803_s25 = smov 78  }
  0x53   :  { %287 = vmatpush1.bf16.msra.mxu1 %v1919_v11  ;;  %v1931_v23 = vsel %vm277_vm0, %v1404_v20, 0  ;;  %v183_v24 = vsel %vm181_vm1, %v1394_v21, 0  ;;  %v95_v32 = vld [vmem:[%s2168_s3] sm:$0x3]  ;;  %s1799_s3 = smov 28   ;;  %s1804_s26 = smov 22  }
  0x54   :  { %288 = vmatprep.subr.bf16.mxu1 %v1922_v12  ;;  %v99_v31 = vsub.s32 0, %v98_v29  ;;  %v103_v34 = vsub.s32 1, %v98_v29  ;;  %vm1058_vm5 = vcmask 179200   ;;  %vm1060_vm6 = vcmask 588800   ;;  %s1805_s27 = smov 72   ;;  %s1806_s30 = smov [#allocation10]  }
  0x55   :  { %193 = vmatpush1.bf16.msra.mxu0 %v1511_v7  ;;  %vm1062_vm7 = vcmask 998400   ;;  %vm1064_vm8 = vcmask 359424   ;;  %vm1066_vm9 = vcmask 769024   ;;  %vm1279_vm10 = vcmask 130048   ;;  %s1370_s9 = sshll.u32 %s1806_s30, 4  ;;  %s1371_s9 = int_to_ptr.vmem [resolvable:$true] %s1370_s9 }
  0x56   :  { %194 = vmatprep.subr.bf16.mxu0 %v1514_v10  ;;  %v100_v37 = vrot.slane %v95_v32, %v99_v31  ;;  %v104_v38 = vrot.slane %v95_v32, %v103_v34  ;;  %s1760_s10 = scalar_lea.vmem %s1371_s9, 32  ;;  %p1765_p5 = scmp.lt.s32.totalorder %s1371_s9, %s1371_s9 }
  0x57   :  { %289 = vmatpush1.bf16.msra.mxu1 %v1924_v15  ;;  %p1761_p4 = scmp.ne.s32.totalorder %s1371_s9, %s1760_s10  ;;  %p1766_p6 = scmp.lt.s32.totalorder %s1760_s10, %s1760_s10 }
  0x58   :  { %1406 = vmatprep.subr.msk.bf16.mxu1 %vm277_vm0, %v1928_v19 }
  0x59   :  { %195 = vmatpush1.bf16.msra.mxu0 %v1517_v13  ;;  %p1767_p7 = por %p1766_p6, %p1765_p5 }
  0x5a   :  { %196 = vmatprep.subr.bf16.mxu0 %v1520_v14 }
  0x5b   :  { %291 = vmatpush1.bf16.msra.mxu1 %v1931_v23  ;;  %p1768_p8 = pnand %p1767_p7, %p1761_p4 }
  0x5c   :  { %370 = vmatprep.subr.bf16.mxu1 %v1911_v6 }
  0x5d   :  { %197 = vmatpush1.bf16.msra.mxu0 %v1523_v18 }
  0x5e   :  { %198 = vmatprep.subr.bf16.mxu0 %v1526_v22  ;;  %317 = vmatmul.mubr.bf16.vlgmr.msra.gmra.mrb[0].mxu1 %v1798_v0 }
  0x5f   :  { %371 = vmatpush1.bf16.msra.mxu1 %v1914_v8  ;;  %402 = vmatprep.mubr.bf16.mxu1 %v1798_v0 }
  0x60   :  { %372 = vmatprep.subr.bf16.mxu1 %v1916_v9 }
  0x61   :  { %199 = vmatpush1.bf16.msra.mxu0 %v1529_v25 }
  0x62   :  { %1396 = vmatprep.subr.msk.bf16.mxu0 %vm181_vm1, %v1395_v26 }
  0x63   :  { %373 = vmatpush1.bf16.msra.mxu1 %v1919_v11 }
  0x64   :  { %374 = vmatprep.subr.bf16.mxu1 %v1922_v12 }
  0x65   :  { %201 = vmatpush1.bf16.msra.mxu0 %v183_v24 }
  0x66   :  { %465 = vmatprep.subr.bf16.mxu0 %v1911_v6 }
  0x67   :  { %375 = vmatpush1.bf16.msra.mxu1 %v1924_v15 }
  0x68   :  { %1397 = vmatmul.mubr.msk.bf16.vlgmr.msra.gmra.mrb[0].mxu0 %vm177_vm2, %v1534_v27  ;;  %1409 = vmatprep.subr.msk.bf16.mxu1 %vm277_vm0, %v1928_v19 }
  0x69   :  { %466 = vmatpush1.bf16.msra.mxu0 %v1914_v8  ;;  %497 = vmatprep.mubr.bf16.mxu0 %v1798_v0 }
  0x6a   :  { %467 = vmatprep.subr.bf16.mxu0 %v1916_v9 }
  0x6b   :  { %377 = vmatpush1.bf16.msra.mxu1 %v1931_v23 }
  0x6c   :  { %560 = vmatprep.subr.bf16.mxu1 %v1911_v6 }
  0x6d   :  { %468 = vmatpush1.bf16.msra.mxu0 %v1919_v11 }
  0x6e   :  { %469 = vmatprep.subr.bf16.mxu0 %v1922_v12 }
  0x71   :  { %470 = vmatpush1.bf16.msra.mxu0 %v1924_v15 }
  0x72   :  { %1413 = vmatprep.subr.msk.bf16.mxu0 %vm277_vm0, %v1928_v19 }
  0x75   :  { %472 = vmatpush1.bf16.msra.mxu0 %v1931_v23 }
  0x76   :  { %655 = vmatprep.subr.bf16.mxu0 %v1911_v6 }
 0x131   :  { %v318_v30 = vpop.f32.mrb[0].mxu1 }
 0x132   :  { %v320_v33 = vpop.f32.mrb[1].mxu1 }
 0x133   :  { %v322_v35 = vpop.f32.mrb[2].mxu1 }
 0x134   :  { %v323_v36 = vpop.f32.mrb[3].mxu1 }
 0x13b   :  { %v222_v39 = vpop.f32.mrb[0].mxu0 }
 0x13c   :  { %v1966_v40 = vadd.f32 %v222_v39, %v100_v37  ;;  %v224_v41 = vpop.f32.mrb[1].mxu0 }
 0x13d   :  { %v1968_v42 = vadd.f32 %v224_v41, %v104_v38  ;;  %v226_v43 = vpop.f32.mrb[2].mxu0 }
 0x13e   :  { %v325_v44 = vadd.f32 %v318_v30, %v1966_v40  ;;  %v1971_v45 = vadd.f32 %v226_v43, %v100_v37  ;;  %v228_v46 = vpop.f32.mrb[3].mxu0 }
 0x13f   :  { %v1973_v47 = vadd.f32 %v228_v46, %v104_v38  ;;  %v326_v48 = vadd.f32 %v320_v33, %v1968_v42 }
 0x140   :  { %1560 = vtanh.f32 %v325_v44  ;;  %v1407_v51 = vmul.f32 -1.442695, %v325_v44 }
 0x141   :  { %1562 = vtanh.f32 %v326_v48  ;;  %v1408_v63 = vmul.f32 -1.442695, %v326_v48 }
 0x142   :  { %1564 = vpow2.f32 %v1407_v51 }
 0x14a   :  { %v1561_v49 = vpop.eup %1560 }
 0x14b   :  { %344 = vrot.lane.b32.xlu0 %v1561_v49, %s1799_s3  ;;  %v1563_v50 = vpop.eup %1562 }
 0x14c   :  { %v1565_v52 = vpop.eup %1564 }
 0x14d   :  { %v330_v53 = vadd.f32 1.0, %v1565_v52 }
 0x14f   :  { %346 = vrot.lane.b32.xlu0 %v1563_v50, %s1799_s3  ;;  %1566 = vrcp.f32 %v330_v53 }
 0x159   :  { %v1567_v56 = vpop.eup %1566 }
 0x15a   :  { %v341_v59 = vmul.f32 0.0, %v1567_v56 }
 0x1bd   :  { %v345_v54 = vpop.permute.xlu0 %344 }
 0x1c1   :  { %v347_v55 = vpop.permute.xlu0 %346 }
 0x1c2   :  { %v349_v57 = vsel %vm348_vm3, %v345_v54, %v347_v55 }
 0x1c3   :  { %v351_v58 = vmul.f32 %v1567_v56, %v349_v57 }
 0x1c5   :  { %353 = vrot.lane.b32.xlu1 %v351_v58, %s1800_s1 }
 0x237   :  { %v354_v60 = vpop.permute.xlu1 %353 }
 0x238   :  { %v356_v61 = vadd.f32 %v354_v60, %v341_v59 }
 0x23a   :  { %1568 = vtanh.f32 %v356_v61  ;;  %v434_v34 = vrot.slane %v356_v61, 6 }
 0x23b   :  { %1570 = vpow2.f32 %v1408_v63 }
 0x244   :  { %v1569_v62 = vpop.eup %1568 }
 0x245   :  { %359 = vrot.lane.b32.xlu1 %v1569_v62, %s1801_s21  ;;  %v1571_v1 = vpop.eup %1570 }
 0x246   :  { %v338_v2 = vadd.f32 1.0, %v1571_v1 }
 0x248   :  { %1572 = vrcp.f32 %v338_v2 }
 0x252   :  { %v1573_v3 = vpop.eup %1572 }
 0x2b7   :  { %v360_v4 = vpop.permute.xlu1 %359 }
 0x2b8   :  { %v1981_v5 = vmul.f32 %v1573_v3, %v360_v4 }
 0x2ba   :  { %v363_v7 = vpack.c.bf16 %v1981_v5, %v1981_v5 }
 0x2bc   :  { %365 = vrot.lane.b32.xlu0 %v363_v7, %s1802_s24 }
 0x32e   :  { %v366_v10 = vpop.permute.xlu0 %365 }
 0x32f   :  { %1410 = vmatmul.mubr.msk.bf16.vlgmr.msra.gmra.mrb[4].mxu1 %vm273_vm4, %v366_v10 }
 0x330   :  { %561 = vmatpush1.bf16.msra.mxu1 %v1914_v8  ;;  %592 = vmatprep.mubr.bf16.mxu1 %v1798_v0 }
 0x331   :  { %562 = vmatprep.subr.bf16.mxu1 %v1916_v9 }
 0x334   :  { %563 = vmatpush1.bf16.msra.mxu1 %v1919_v11 }
 0x335   :  { %564 = vmatprep.subr.bf16.mxu1 %v1922_v12 }
 0x338   :  { %565 = vmatpush1.bf16.msra.mxu1 %v1924_v15 }
 0x339   :  { %1417 = vmatprep.subr.msk.bf16.mxu1 %vm277_vm0, %v1928_v19 }
 0x33c   :  { %567 = vmatpush1.bf16.msra.mxu1 %v1931_v23 }
 0x33d   :  { %743 = vmatprep.subr.bf16.mxu1 %v1911_v6 }
 0x402   :  { %v404_v13 = vpop.f32.mrb[4].mxu1 }
 0x403   :  { %v413_v14 = vrot.slane %v404_v13, 6  ;;  %v406_v16 = vpop.f32.mrb[5].mxu1 }
 0x404   :  { %v414_v17 = vrot.slane %v406_v16, 6  ;;  %v408_v18 = vpop.f32.mrb[6].mxu1 }
 0x405   :  { %v417_v20 = vadd.f32 %v413_v14, %v1966_v40  ;;  %v409_v21 = vpop.f32.mrb[7].mxu1 }
 0x406   :  { %v418_v22 = vadd.f32 %v414_v17, %v1968_v42 }
 0x407   :  { %1574 = vtanh.f32 %v417_v20  ;;  %v1411_v26 = vmul.f32 -1.442695, %v417_v20 }
 0x408   :  { %1576 = vtanh.f32 %v418_v22  ;;  %v1412_v39 = vmul.f32 -1.442695, %v418_v22 }
 0x409   :  { %1578 = vpow2.f32 %v1411_v26 }
 0x411   :  { %v1575_v24 = vpop.eup %1574 }
 0x412   :  { %v1577_v25 = vpop.eup %1576  ;;  %439 = vrot.lane.b32.xlu1 %v1575_v24, %s1799_s3 }
 0x413   :  { %441 = vrot.lane.b32.xlu0 %v1577_v25, %s1799_s3  ;;  %v1579_v27 = vpop.eup %1578 }
 0x414   :  { %v422_v28 = vadd.f32 1.0, %v1579_v27 }
 0x416   :  { %1580 = vrcp.f32 %v422_v28 }
 0x420   :  { %v1581_v31 = vpop.eup %1580 }
 0x421   :  { %v436_v35 = vmul.f32 %v1581_v31, %v434_v34 }
 0x484   :  { %v440_v29 = vpop.permute.xlu1 %439 }
 0x485   :  { %v442_v30 = vpop.permute.xlu0 %441 }
 0x486   :  { %v443_v32 = vsel %vm348_vm3, %v440_v29, %v442_v30 }
 0x487   :  { %v445_v33 = vmul.f32 %v1581_v31, %v443_v32 }
 0x489   :  { %447 = vrot.lane.b32.xlu1 %v445_v33, %s1800_s1 }
 0x4fb   :  { %v448_v36 = vpop.permute.xlu1 %447 }
 0x4fc   :  { %v450_v37 = vadd.f32 %v448_v36, %v436_v35 }
 0x4fe   :  { %1582 = vtanh.f32 %v450_v37  ;;  %v529_v13 = vrot.slane %v450_v37, 6 }
 0x4ff   :  { %1584 = vpow2.f32 %v1412_v39 }
 0x508   :  { %v1583_v38 = vpop.eup %1582 }
 0x509   :  { %453 = vrot.lane.b32.xlu0 %v1583_v38, %s1801_s21  ;;  %v1585_v41 = vpop.eup %1584 }
 0x50a   :  { %v430_v43 = vadd.f32 1.0, %v1585_v41 }
 0x50c   :  { %1586 = vrcp.f32 %v430_v43 }
 0x516   :  { %v1587_v44 = vpop.eup %1586 }
 0x57b   :  { %v454_v46 = vpop.permute.xlu0 %453 }
 0x57c   :  { %v2004_v48 = vmul.f32 %v1587_v44, %v454_v46 }
 0x57e   :  { %v457_v49 = vpack.c.bf16 %v2004_v48, %v2004_v48 }
 0x580   :  { %v459_v50 = vrot.slane %v457_v49, 1 }
 0x582   :  { %460 = vrot.lane.b32.xlu1 %v459_v50, %s1802_s24 }
 0x5f4   :  { %v461_v51 = vpop.permute.xlu1 %460 }
 0x5f5   :  { %1414 = vmatmul.mubr.msk.bf16.vlgmr.msra.gmra.mrb[4].mxu0 %vm273_vm4, %v461_v51 }
 0x5f6   :  { %656 = vmatpush1.bf16.msra.mxu0 %v1914_v8  ;;  %687 = vmatprep.mubr.bf16.mxu0 %v1798_v0 }
 0x5f7   :  { %657 = vmatprep.subr.bf16.mxu0 %v1916_v9 }
 0x5fa   :  { %658 = vmatpush1.bf16.msra.mxu0 %v1919_v11 }
 0x5fb   :  { %659 = vmatprep.subr.bf16.mxu0 %v1922_v12 }
 0x5fe   :  { %660 = vmatpush1.bf16.msra.mxu0 %v1924_v15 }
 0x5ff   :  { %1421 = vmatprep.subr.msk.bf16.mxu0 %vm277_vm0, %v1928_v19 }
 0x602   :  { %662 = vmatpush1.bf16.msra.mxu0 %v1931_v23 }
 0x603   :  { %838 = vmatprep.subr.bf16.mxu0 %v1911_v6 }
 0x6c8   :  { %v499_v52 = vpop.f32.mrb[4].mxu0 }
 0x6c9   :  { %v508_v53 = vrot.slane %v499_v52, 4  ;;  %v501_v54 = vpop.f32.mrb[5].mxu0 }
 0x6ca   :  { %v509_v55 = vrot.slane %v501_v54, 4  ;;  %v503_v56 = vpop.f32.mrb[6].mxu0 }
 0x6cb   :  { %v512_v57 = vadd.f32 %v508_v53, %v1966_v40  ;;  %v504_v58 = vpop.f32.mrb[7].mxu0 }
 0x6cc   :  { %v513_v59 = vadd.f32 %v509_v55, %v1968_v42 }
 0x6cd   :  { %1588 = vtanh.f32 %v512_v57  ;;  %v1415_v62 = vmul.f32 -1.442695, %v512_v57 }
 0x6ce   :  { %1590 = vtanh.f32 %v513_v59  ;;  %v1416_v20 = vmul.f32 -1.442695, %v513_v59 }
 0x6cf   :  { %1592 = vpow2.f32 %v1415_v62 }
 0x6d7   :  { %v1589_v60 = vpop.eup %1588 }
 0x6d8   :  { %v1591_v61 = vpop.eup %1590  ;;  %534 = vrot.lane.b32.xlu0 %v1589_v60, %s1799_s3 }
 0x6d9   :  { %536 = vrot.lane.b32.xlu1 %v1591_v61, %s1799_s3  ;;  %v1593_v63 = vpop.eup %1592 }
 0x6da   :  { %v517_v1 = vadd.f32 1.0, %v1593_v63 }
 0x6dc   :  { %1594 = vrcp.f32 %v517_v1 }
 0x6e6   :  { %v1595_v4 = vpop.eup %1594 }
 0x6e7   :  { %v531_v14 = vmul.f32 %v1595_v4, %v529_v13 }
 0x74a   :  { %v535_v2 = vpop.permute.xlu0 %534 }
 0x74b   :  { %v537_v3 = vpop.permute.xlu1 %536 }
 0x74c   :  { %v538_v7 = vsel %vm348_vm3, %v535_v2, %v537_v3 }
 0x74d   :  { %v540_v10 = vmul.f32 %v1595_v4, %v538_v7 }
 0x74f   :  { %542 = vrot.lane.b32.xlu0 %v540_v10, %s1800_s1 }
 0x7c1   :  { %v543_v16 = vpop.permute.xlu0 %542 }
 0x7c2   :  { %v545_v17 = vadd.f32 %v543_v16, %v531_v14 }
 0x7c4   :  { %1596 = vtanh.f32 %v545_v17 }
 0x7c5   :  { %1598 = vpow2.f32 %v1416_v20 }
 0x7ce   :  { %v1597_v18 = vpop.eup %1596 }
 0x7cf   :  { %548 = vrot.lane.b32.xlu1 %v1597_v18, %s1801_s21  ;;  %v1599_v21 = vpop.eup %1598 }
 0x7d0   :  { %v525_v22 = vadd.f32 1.0, %v1599_v21 }
 0x7d2   :  { %1600 = vrcp.f32 %v525_v22 }
 0x7dc   :  { %v1601_v24 = vpop.eup %1600 }
 0x841   :  { %v549_v25 = vpop.permute.xlu1 %548 }
 0x842   :  { %v2027_v26 = vmul.f32 %v1601_v24, %v549_v25 }
 0x844   :  { %v552_v27 = vpack.c.bf16 %v2027_v26, %v2027_v26 }
 0x846   :  { %v554_v28 = vrot.slane %v552_v27, 2 }
 0x848   :  { %555 = vrot.lane.b32.xlu0 %v554_v28, %s1802_s24 }
 0x8ba   :  { %v556_v29 = vpop.permute.xlu0 %555 }
 0x8bb   :  { %1418 = vmatmul.mubr.msk.bf16.vlgmr.msra.gmra.mrb[8].mxu1 %vm273_vm4, %v556_v29 }
 0x8bc   :  { %744 = vmatpush1.bf16.msra.mxu1 %v1914_v8  ;;  %775 = vmatprep.mubr.bf16.mxu1 %v1798_v0 }
 0x8bd   :  { %745 = vmatprep.subr.bf16.mxu1 %v1916_v9 }
 0x8c0   :  { %746 = vmatpush1.bf16.msra.mxu1 %v1919_v11 }
 0x8c1   :  { %747 = vmatprep.subr.bf16.mxu1 %v1922_v12 }
 0x8c4   :  { %748 = vmatpush1.bf16.msra.mxu1 %v1924_v15 }
 0x8c5   :  { %1425 = vmatprep.subr.msk.bf16.mxu1 %vm277_vm0, %v1928_v19 }
 0x8c8   :  { %750 = vmatpush1.bf16.msra.mxu1 %v1931_v23 }
 0x8c9   :  { %933 = vmatprep.subr.bf16.mxu1 %v1911_v6 }
 0x98e   :  { %v594_v30 = vpop.f32.mrb[8].mxu1 }
 0x98f   :  { %v603_v31 = vrot.slane %v594_v30, 2  ;;  %v596_v32 = vpop.f32.mrb[9].mxu1 }
 0x990   :  { %v604_v33 = vrot.slane %v596_v32, 2  ;;  %v598_v34 = vpop.f32.mrb[10].mxu1 }
 0x991   :  { %v607_v35 = vadd.f32 %v603_v31, %v1966_v40  ;;  %v599_v36 = vpop.f32.mrb[11].mxu1 }
 0x992   :  { %v608_v37 = vadd.f32 %v604_v33, %v1968_v42  ;;  %v624_v42 = vrot.slane %v545_v17, 6 }
 0x993   :  { %1602 = vtanh.f32 %v607_v35  ;;  %v1419_v41 = vmul.f32 -1.442695, %v607_v35 }
 0x994   :  { %1604 = vtanh.f32 %v608_v37  ;;  %v1420_v55 = vmul.f32 -1.442695, %v608_v37 }
 0x995   :  { %1606 = vpow2.f32 %v1419_v41 }
 0x99d   :  { %v1603_v38 = vpop.eup %1602 }
 0x99e   :  { %v1605_v39 = vpop.eup %1604  ;;  %629 = vrot.lane.b32.xlu1 %v1603_v38, %s1799_s3 }
 0x99f   :  { %631 = vrot.lane.b32.xlu0 %v1605_v39, %s1799_s3  ;;  %v1607_v6 = vpop.eup %1606 }
 0x9a0   :  { %v612_v43 = vadd.f32 1.0, %v1607_v6 }
 0x9a2   :  { %1608 = vrcp.f32 %v612_v43 }
 0x9ac   :  { %v1609_v49 = vpop.eup %1608 }
 0x9ad   :  { %v626_v51 = vmul.f32 %v1609_v49, %v624_v42 }
 0xa10   :  { %v630_v44 = vpop.permute.xlu1 %629 }
 0xa11   :  { %v632_v46 = vpop.permute.xlu0 %631 }
 0xa12   :  { %v633_v40 = vsel %vm348_vm3, %v630_v44, %v632_v46 }
 0xa13   :  { %v635_v50 = vmul.f32 %v1609_v49, %v633_v40 }
 0xa15   :  { %637 = vrot.lane.b32.xlu1 %v635_v50, %s1800_s1 }
 0xa87   :  { %v638_v52 = vpop.permute.xlu1 %637 }
 0xa88   :  { %v640_v53 = vadd.f32 %v638_v52, %v626_v51 }
 0xa8a   :  { %1610 = vtanh.f32 %v640_v53  ;;  %v713_v27 = vrot.slane %v640_v53, 6 }
 0xa8b   :  { %1612 = vpow2.f32 %v1420_v55 }
 0xa94   :  { %v1611_v54 = vpop.eup %1610 }
 0xa95   :  { %643 = vrot.lane.b32.xlu0 %v1611_v54, %s1801_s21  ;;  %v1613_v56 = vpop.eup %1612 }
 0xa96   :  { %v620_v57 = vadd.f32 1.0, %v1613_v56 }
 0xa98   :  { %1614 = vrcp.f32 %v620_v57 }
 0xaa2   :  { %v1615_v58 = vpop.eup %1614 }
 0xb07   :  { %v644_v59 = vpop.permute.xlu0 %643 }
 0xb08   :  { %v2050_v60 = vmul.f32 %v1615_v58, %v644_v59 }
 0xb0a   :  { %v647_v61 = vpack.c.bf16 %v2050_v60, %v2050_v60 }
 0xb0c   :  { %v649_v62 = vrot.slane %v647_v61, 3 }
 0xb0e   :  { %650 = vrot.lane.b32.xlu1 %v649_v62, %s1802_s24 }
 0xb80   :  { %v651_v63 = vpop.permute.xlu1 %650 }
 0xb81   :  { %1422 = vmatmul.mubr.msk.bf16.vlgmr.msra.gmra.mrb[8].mxu0 %vm273_vm4, %v651_v63 }
 0xb82   :  { %839 = vmatpush1.bf16.msra.mxu0 %v1914_v8  ;;  %870 = vmatprep.mubr.bf16.mxu0 %v1798_v0 }
 0xb83   :  { %840 = vmatprep.subr.bf16.mxu0 %v1916_v9 }
 0xb86   :  { %841 = vmatpush1.bf16.msra.mxu0 %v1919_v11 }
 0xb87   :  { %842 = vmatprep.subr.bf16.mxu0 %v1922_v12 }
 0xb8a   :  { %843 = vmatpush1.bf16.msra.mxu0 %v1924_v15 }
 0xb8b   :  { %1429 = vmatprep.subr.msk.bf16.mxu0 %vm277_vm0, %v1928_v19 }
 0xb8e   :  { %845 = vmatpush1.bf16.msra.mxu0 %v1931_v23 }
 0xc54   :  { %v689_v1 = vpop.f32.mrb[8].mxu0 }
 0xc55   :  { %v696_v2 = vadd.f32 %v689_v1, %v1971_v45  ;;  %v691_v3 = vpop.f32.mrb[9].mxu0 }
 0xc56   :  { %v697_v4 = vadd.f32 %v691_v3, %v1973_v47  ;;  %v693_v7 = vpop.f32.mrb[10].mxu0 }
 0xc57   :  { %1616 = vtanh.f32 %v696_v2  ;;  %v694_v10 = vpop.f32.mrb[11].mxu0  ;;  %v1423_v16 = vmul.f32 -1.442695, %v696_v2 }
 0xc58   :  { %1618 = vtanh.f32 %v697_v4  ;;  %v1424_v32 = vmul.f32 -1.442695, %v697_v4 }
 0xc59   :  { %1620 = vpow2.f32 %v1423_v16 }
 0xc61   :  { %v1617_v13 = vpop.eup %1616 }
 0xc62   :  { %v1619_v14 = vpop.eup %1618  ;;  %718 = vrot.lane.b32.xlu0 %v1617_v13, %s1799_s3 }
 0xc63   :  { %720 = vrot.lane.b32.xlu1 %v1619_v14, %s1799_s3  ;;  %v1621_v17 = vpop.eup %1620 }
 0xc64   :  { %v701_v18 = vadd.f32 1.0, %v1621_v17 }
 0xc66   :  { %1622 = vrcp.f32 %v701_v18 }
 0xc70   :  { %v1623_v22 = vpop.eup %1622 }
 0xc71   :  { %v715_v28 = vmul.f32 %v1623_v22, %v713_v27 }
 0xcd4   :  { %v719_v20 = vpop.permute.xlu0 %718 }
 0xcd5   :  { %v721_v21 = vpop.permute.xlu1 %720 }
 0xcd6   :  { %v722_v24 = vsel %vm348_vm3, %v719_v20, %v721_v21 }
 0xcd7   :  { %v724_v25 = vmul.f32 %v1623_v22, %v722_v24 }
 0xcd9   :  { %726 = vrot.lane.b32.xlu0 %v724_v25, %s1800_s1 }
 0xd4b   :  { %v727_v29 = vpop.permute.xlu0 %726 }
 0xd4c   :  { %v729_v30 = vadd.f32 %v727_v29, %v715_v28 }
 0xd4e   :  { %1624 = vtanh.f32 %v729_v30  ;;  %v807_v53 = vrot.slane %v729_v30, 6 }
 0xd4f   :  { %1626 = vpow2.f32 %v1424_v32 }
 0xd58   :  { %v1625_v31 = vpop.eup %1624 }
 0xd59   :  { %732 = vrot.lane.b32.xlu1 %v1625_v31, %s1801_s21  ;;  %v1627_v33 = vpop.eup %1626 }
 0xd5a   :  { %v709_v34 = vadd.f32 1.0, %v1627_v33 }
 0xd5c   :  { %1628 = vrcp.f32 %v709_v34 }
 0xd66   :  { %v1629_v35 = vpop.eup %1628 }
 0xdcb   :  { %v733_v36 = vpop.permute.xlu1 %732 }
 0xdcc   :  { %v2072_v37 = vmul.f32 %v1629_v35, %v733_v36 }
 0xdce   :  { %v736_v38 = vpack.c.bf16 %v2072_v37, %v2072_v37 }
 0xdd0   :  { %738 = vrot.lane.b32.xlu0 %v736_v38, %s1802_s24 }
 0xe42   :  { %v739_v39 = vpop.permute.xlu0 %738 }
 0xe43   :  { %1426 = vmatmul.mubr.msk.bf16.vlgmr.msra.gmra.mrb[12].mxu1 %vm273_vm4, %v739_v39 }
 0xe44   :  { %934 = vmatpush1.bf16.msra.mxu1 %v1914_v8  ;;  %965 = vmatprep.mubr.bf16.mxu1 %v1798_v0 }
 0xe45   :  { %935 = vmatprep.subr.bf16.mxu1 %v1916_v9 }
 0xe48   :  { %936 = vmatpush1.bf16.msra.mxu1 %v1919_v11 }
 0xe49   :  { %937 = vmatprep.subr.bf16.mxu1 %v1922_v12 }
 0xe4c   :  { %938 = vmatpush1.bf16.msra.mxu1 %v1924_v15 }
 0xe4d   :  { %1433 = vmatprep.subr.msk.bf16.mxu1 %vm277_vm0, %v1928_v19 }
 0xe50   :  { %940 = vmatpush1.bf16.msra.mxu1 %v1931_v23 }
 0xe51   :  { %1323 = vmatprep.subr.bf16.mxu1 %v1798_v0 }
 0xf16   :  { %v777_v41 = vpop.f32.mrb[12].mxu1 }
 0xf17   :  { %v786_v6 = vrot.slane %v777_v41, 6  ;;  %v779_v8 = vpop.f32.mrb[13].mxu1 }
 0xf18   :  { %v787_v43 = vrot.slane %v779_v8, 6  ;;  %v781_v44 = vpop.f32.mrb[14].mxu1 }
 0xf19   :  { %v790_v9 = vadd.f32 %v786_v6, %v1971_v45  ;;  %v782_v46 = vpop.f32.mrb[15].mxu1 }
 0xf1a   :  { %v791_v11 = vadd.f32 %v787_v43, %v1973_v47 }
 0xf1b   :  { %1630 = vtanh.f32 %v790_v9  ;;  %v1427_v19 = vmul.f32 -1.442695, %v790_v9 }
 0xf1c   :  { %1632 = vtanh.f32 %v791_v11  ;;  %v1428_v58 = vmul.f32 -1.442695, %v791_v11 }
 0xf1d   :  { %1634 = vpow2.f32 %v1427_v19 }
 0xf25   :  { %v1631_v12 = vpop.eup %1630 }
 0xf26   :  { %v1633_v15 = vpop.eup %1632  ;;  %812 = vrot.lane.b32.xlu1 %v1631_v12, %s1799_s3 }
 0xf27   :  { %814 = vrot.lane.b32.xlu0 %v1633_v15, %s1799_s3  ;;  %v1635_v23 = vpop.eup %1634 }
 0xf28   :  { %v795_v49 = vadd.f32 1.0, %v1635_v23 }
 0xf2a   :  { %1636 = vrcp.f32 %v795_v49 }
 0xf34   :  { %v1637_v42 = vpop.eup %1636 }
 0xf35   :  { %v809_v54 = vmul.f32 %v1637_v42, %v807_v53 }
 0xf98   :  { %v813_v40 = vpop.permute.xlu1 %812 }
 0xf99   :  { %v815_v50 = vpop.permute.xlu0 %814 }
 0xf9a   :  { %v816_v51 = vsel %vm348_vm3, %v813_v40, %v815_v50 }
 0xf9b   :  { %v818_v52 = vmul.f32 %v1637_v42, %v816_v51 }
 0xf9d   :  { %820 = vrot.lane.b32.xlu1 %v818_v52, %s1800_s1 }
0x100f   :  { %v821_v55 = vpop.permute.xlu1 %820 }
0x1010   :  { %v823_v56 = vadd.f32 %v821_v55, %v809_v54 }
0x1012   :  { %1638 = vtanh.f32 %v823_v56  ;;  %v902_v33 = vrot.slane %v823_v56, 6 }
0x1013   :  { %1640 = vpow2.f32 %v1428_v58 }
0x101c   :  { %v1639_v57 = vpop.eup %1638 }
0x101d   :  { %826 = vrot.lane.b32.xlu0 %v1639_v57, %s1801_s21  ;;  %v1641_v59 = vpop.eup %1640 }
0x101e   :  { %v803_v61 = vadd.f32 1.0, %v1641_v59  ;;  %v1030_v59 = vrot.slane %v2027_v26, 4  ;;  %v1541_v26 = vld [vmem:[#allocation8 + $0x58] sm:$0xff]  }
0x1020   :  { %1642 = vrcp.f32 %v803_v61 }
0x102a   :  { %v1643_v62 = vpop.eup %1642 }
0x108f   :  { %v827_v63 = vpop.permute.xlu0 %826 }
0x1090   :  { %v2095_v1 = vmul.f32 %v1643_v62, %v827_v63  ;;  %v1535_v62 = vld [vmem:[#allocation8 + $0x40] sm:$0xff]  }
0x1091   :  { %v1536_v63 = vld [vmem:[#allocation8] sm:$0xff]   ;;  %1464 = vmatprep.subr.bf16.mxu0 %v1535_v62 }
0x1092   :  { %v830_v2 = vpack.c.bf16 %v2095_v1, %v2095_v1  ;;  %v1042_v61 = vrot.slane %v2095_v1, 2  ;;  %v1544_v1 = vld [vmem:[#allocation8 + $0x20] sm:$0xff]  }
0x1094   :  { %v832_v3 = vrot.slane %v830_v2, 1  ;;  %v1537_v2 = vld [vmem:[#allocation8 + $0x48] sm:$0xff]  }
0x1096   :  { %833 = vrot.lane.b32.xlu1 %v832_v3, %s1802_s24  ;;  %v1538_v3 = vld [vmem:[#allocation8 + $0x8] sm:$0xff]  }
0x1108   :  { %v834_v4 = vpop.permute.xlu1 %833 }
0x1109   :  { %1430 = vmatmul.mubr.msk.bf16.vlgmr.msra.gmra.mrb[12].mxu0 %vm273_vm4, %v834_v4  ;;  %v1539_v4 = vld [vmem:[#allocation8 + $0x50] sm:$0xff]  }
0x110a   :  { %1465 = vmatpush3.bf16.msra.mxu0 %v1536_v63 }
0x110b   :  { %1466 = vmatprep.subr.bf16.mxu0 %v1537_v2 }
0x110e   :  { %1467 = vmatpush3.bf16.msra.mxu0 %v1538_v3 }
0x110f   :  { %1468 = vmatprep.subr.bf16.mxu0 %v1539_v4 }
0x11dc   :  { %v872_v7 = vpop.f32.mrb[12].mxu0 }
0x11dd   :  { %v881_v10 = vrot.slane %v872_v7, 4  ;;  %v874_v13 = vpop.f32.mrb[13].mxu0  ;;  %v1540_v7 = vld [vmem:[#allocation8 + $0x10] sm:$0xff]  }
0x11de   :  { %v882_v14 = vrot.slane %v874_v13, 4  ;;  %v876_v16 = vpop.f32.mrb[14].mxu0  ;;  %1469 = vmatpush3.bf16.msra.mxu0 %v1540_v7 }
0x11df   :  { %v885_v17 = vadd.f32 %v881_v10, %v1971_v45  ;;  %v877_v18 = vpop.f32.mrb[15].mxu0  ;;  %v1542_v10 = vld [vmem:[#allocation8 + $0x18] sm:$0xff]   ;;  %1470 = vmatprep.subr.bf16.mxu0 %v1541_v26  ;;  %v1545_v16 = vld [vmem:[#allocation8 + $0x68] sm:$0xff]  }
0x11e0   :  { %v886_v20 = vadd.f32 %v882_v14, %v1973_v47  ;;  %v1546_v18 = vld [vmem:[#allocation8 + $0x28] sm:$0xff]  }
0x11e1   :  { %1644 = vtanh.f32 %v885_v17  ;;  %v1431_v24 = vmul.f32 -1.442695, %v885_v17 }
0x11e2   :  { %1646 = vtanh.f32 %v886_v20  ;;  %v1432_v39 = vmul.f32 -1.442695, %v886_v20  ;;  %1471 = vmatpush3.bf16.msra.mxu0 %v1542_v10 }
0x11e3   :  { %1648 = vpow2.f32 %v1431_v24  ;;  %v1549_v24 = vld [vmem:[#allocation8 + $0x78] sm:$0xff]  }
0x11eb   :  { %v1645_v21 = vpop.eup %1644 }
0x11ec   :  { %v1647_v22 = vpop.eup %1646  ;;  %907 = vrot.lane.b32.xlu0 %v1645_v21, %s1799_s3  ;;  %v1547_v21 = vld [vmem:[#allocation8 + $0x70] sm:$0xff]  }
0x11ed   :  { %909 = vrot.lane.b32.xlu1 %v1647_v22, %s1799_s3  ;;  %v1649_v25 = vpop.eup %1648  ;;  %v1548_v22 = vld [vmem:[#allocation8 + $0x30] sm:$0xff]  }
0x11ee   :  { %v890_v27 = vadd.f32 1.0, %v1649_v25  ;;  %v1550_v25 = vld [vmem:[#allocation8 + $0x38] sm:$0xff]  }
0x11f0   :  { %1650 = vrcp.f32 %v890_v27 }
0x11fa   :  { %v1651_v30 = vpop.eup %1650 }
0x11fb   :  { %v904_v34 = vmul.f32 %v1651_v30, %v902_v33 }
0x125e   :  { %v908_v28 = vpop.permute.xlu0 %907 }
0x125f   :  { %v910_v29 = vpop.permute.xlu1 %909 }
0x1260   :  { %v911_v31 = vsel %vm348_vm3, %v908_v28, %v910_v29  ;;  %v1551_v28 = vld [vmem:[#allocation8 + $0x80] sm:$0xff]   ;;  %v1552_v29 = vld [vmem:[#allocation8 + $0x88] sm:$0xff]  }
0x1261   :  { %v913_v32 = vmul.f32 %v1651_v30, %v911_v31  ;;  %v1553_v30 = vld [vmem:[#allocation8 + $0x90] sm:$0xff]   ;;  %v1025_v31 = vrot.slane %v2004_v48, 2 }
0x1262   :  { %v1557_v48 = vld [vmem:[#allocation8 + $0xb0] sm:$0xff]  }
0x1263   :  { %915 = vrot.lane.b32.xlu0 %v913_v32, %s1800_s1  ;;  %v1554_v32 = vld [vmem:[#allocation8 + $0x98] sm:$0xff]  }
0x12d5   :  { %v916_v35 = vpop.permute.xlu0 %915 }
0x12d6   :  { %v2107_v36 = vadd.f32 %v916_v35, %v904_v34  ;;  %v1555_v34 = vld [vmem:[#allocation8 + $0xa0] sm:$0xff]   ;;  %v1558_v35 = vld [vmem:[#allocation8 + $0xb8] sm:$0xff]  }
0x12d8   :  { %1652 = vtanh.f32 %v2107_v36  ;;  %v997_v13 = vrot.slane %v2107_v36, 6 }
0x12d9   :  { %1654 = vpow2.f32 %v1432_v39 }
0x12e2   :  { %v1653_v38 = vpop.eup %1652 }
0x12e3   :  { %921 = vrot.lane.b32.xlu1 %v1653_v38, %s1801_s21  ;;  %v1655_v41 = vpop.eup %1654 }
0x12e4   :  { %v898_v6 = vadd.f32 1.0, %v1655_v41  ;;  %v1559_v41 = vld [vmem:[#allocation8 + $0xc0] sm:$0xff]  }
0x12e6   :  { %1656 = vrcp.f32 %v898_v6 }
0x12f0   :  { %v1657_v8 = vpop.eup %1656 }
0x1355   :  { %v922_v43 = vpop.permute.xlu1 %921 }
0x1356   :  { %v2111_v44 = vmul.f32 %v1657_v8, %v922_v43 }
0x1358   :  { %v925_v9 = vpack.c.bf16 %v2111_v44, %v2111_v44  ;;  %v1047_v33 = vrot.slane %v2111_v44, 4 }
0x135a   :  { %v927_v46 = vrot.slane %v925_v9, 2 }
0x135c   :  { %928 = vrot.lane.b32.xlu0 %v927_v46, %s1802_s24  ;;  %v1035_v46 = vrot.slane %v2050_v60, 6 }
0x13ce   :  { %v929_v11 = vpop.permute.xlu0 %928 }
0x13cf   :  { %1434 = vmatmul.mubr.msk.bf16.vlgmr.msra.gmra.mrb[16].mxu1 %vm273_vm4, %v929_v11 }
0x13d0   :  { %1324 = vmatpush1.bf16.msra.mxu1 %v1551_v28 }
0x13d1   :  { %1325 = vmatprep.subr.bf16.mxu1 %v1798_v0 }
0x13d4   :  { %1326 = vmatpush1.bf16.msra.mxu1 %v1552_v29 }
0x13d5   :  { %1327 = vmatprep.subr.bf16.mxu1 %v1798_v0 }
0x13d8   :  { %1328 = vmatpush1.bf16.msra.mxu1 %v1553_v30 }
0x13d9   :  { %1329 = vmatprep.subr.bf16.mxu1 %v1798_v0 }
0x13dc   :  { %1330 = vmatpush1.bf16.msra.mxu1 %v1554_v32 }
0x13dd   :  { %1331 = vmatprep.subr.bf16.mxu1 %v1798_v0 }
0x13e0   :  { %1332 = vmatpush1.bf16.msra.mxu1 %v1555_v34 }
0x13e1   :  { %1333 = vmatprep.subr.bf16.mxu1 %v1798_v0 }
0x14a2   :  { %v967_v12 = vpop.f32.mrb[16].mxu1 }
0x14a3   :  { %v976_v15 = vrot.slane %v967_v12, 2  ;;  %v969_v19 = vpop.f32.mrb[17].mxu1 }
0x14a4   :  { %v977_v23 = vrot.slane %v969_v19, 2  ;;  %v971_v49 = vpop.f32.mrb[18].mxu1 }
0x14a5   :  { %v980_v40 = vadd.f32 %v976_v15, %v1971_v45  ;;  %v972_v50 = vpop.f32.mrb[19].mxu1 }
0x14a6   :  { %v2119_v42 = vadd.f32 %v977_v23, %v1973_v47 }
0x14a7   :  { %1658 = vtanh.f32 %v980_v40  ;;  %v1435_v53 = vmul.f32 -1.442695, %v980_v40 }
0x14a8   :  { %1660 = vtanh.f32 %v2119_v42  ;;  %v1436_v36 = vmul.f32 -1.442695, %v2119_v42 }
0x14a9   :  { %1662 = vpow2.f32 %v1435_v53 }
0x14b1   :  { %v1659_v51 = vpop.eup %1658 }
0x14b2   :  { %v1661_v52 = vpop.eup %1660  ;;  %1002 = vrot.lane.b32.xlu1 %v1659_v51, %s1799_s3 }
0x14b3   :  { %1004 = vrot.lane.b32.xlu0 %v1661_v52, %s1799_s3  ;;  %v1663_v54 = vpop.eup %1662 }
0x14b4   :  { %v985_v55 = vadd.f32 1.0, %v1663_v54 }
0x14b6   :  { %1664 = vrcp.f32 %v985_v55 }
0x14c0   :  { %v1665_v57 = vpop.eup %1664 }
0x14c1   :  { %v999_v14 = vmul.f32 %v1665_v57, %v997_v13 }
0x1524   :  { %v1003_v56 = vpop.permute.xlu1 %1002 }
0x1525   :  { %v1005_v45 = vpop.permute.xlu0 %1004 }
0x1526   :  { %v1006_v47 = vsel %vm348_vm3, %v1003_v56, %v1005_v45 }
0x1527   :  { %v1008_v58 = vmul.f32 %v1665_v57, %v1006_v47 }
0x1529   :  { %1010 = vrot.lane.b32.xlu1 %v1008_v58, %s1800_s1 }
0x152d   :  { %1031 = vrot.lane.b32.xlu1 %v1030_v59, %s1803_s25 }
0x1531   :  { %1021 = vrot.lane.b32.xlu1 %v1981_v5, %s1802_s24  ;;  %v1543_v5 = vld [vmem:[#allocation8 + $0x60] sm:$0xff]  }
0x1532   :  { %1472 = vmatprep.subr.bf16.mxu0 %v1543_v5 }
0x1533   :  { %1473 = vmatpush3.bf16.msra.mxu0 %v1544_v1 }
0x1534   :  { %1474 = vmatprep.subr.bf16.mxu0 %v1545_v16 }
0x1535   :  { %1043 = vrot.lane.b32.xlu1 %v1042_v61, %s1801_s21  ;;  %v1437_v61 = vld [vmem:[%s2170_s5] ss:$0 sm:$0xff] }
0x1537   :  { %1475 = vmatpush3.bf16.msra.mxu0 %v1546_v18 }
0x1538   :  { %1476 = vmatprep.subr.bf16.mxu0 %v1547_v21 }
0x153b   :  { %1477 = vmatpush3.bf16.msra.mxu0 %v1548_v22 }
0x153c   :  { %1478 = vmatprep.subr.bf16.mxu0 %v1549_v24 }
0x153f   :  { %1479 = vmatpush3.bf16.msra.mxu0 %v1550_v25 }
0x159b   :  { %v1011_v17 = vpop.permute.xlu1 %1010 }
0x159c   :  { %v1013_v20 = vadd.f32 %v1011_v17, %v999_v14 }
0x159e   :  { %1666 = vtanh.f32 %v1013_v20 }
0x159f   :  { %1668 = vpow2.f32 %v1436_v36  ;;  %v1032_v6 = vpop.permute.xlu1 %1031 }
0x15a3   :  { %v1022_v8 = vpop.permute.xlu1 %1021 }
0x15a7   :  { %v1044_v15 = vpop.permute.xlu1 %1043 }
0x15a8   :  { %v1667_v27 = vpop.eup %1666 }
0x15a9   :  { %1016 = vrot.lane.b32.xlu0 %v1667_v27, %s1801_s21  ;;  %v1669_v38 = vpop.eup %1668 }
0x15aa   :  { %v993_v39 = vadd.f32 1.0, %v1669_v38 }
0x15ac   :  { %1670 = vrcp.f32 %v993_v39 }
0x15ad   :  { %1038 = vrot.lane.b32.xlu0 %v2072_v37, %s1800_s1  ;;  %v1556_v37 = vld [vmem:[#allocation8 + $0xa8] sm:$0xff]  }
0x15ae   :  { %1334 = vmatpush1.bf16.msra.mxu1 %v1556_v37 }
0x15af   :  { %1335 = vmatprep.subr.bf16.mxu1 %v1798_v0 }
0x15b1   :  { %1026 = vrot.lane.b32.xlu0 %v1025_v31, %s1799_s3 }
0x15b2   :  { %1336 = vmatpush1.bf16.msra.mxu1 %v1557_v48 }
0x15b3   :  { %1337 = vmatprep.subr.bf16.mxu1 %v1798_v0 }
0x15b5   :  { %1048 = vrot.lane.b32.xlu0 %v1047_v33, %s1804_s26 }
0x15b6   :  { %1338 = vmatpush1.bf16.msra.mxu1 %v1558_v35  ;;  %v1671_v43 = vpop.eup %1670 }
0x15b7   :  { %1339 = vmatprep.subr.bf16.mxu1 %v1798_v0  ;;  %v1059_v0 = vsel %vm1058_vm5, %v1032_v6, %v1035_v46 }
0x15ba   :  { %1340 = vmatpush1.bf16.msra.mxu1 %v1559_v41 }
0x161b   :  { %v1017_v44 = vpop.permute.xlu0 %1016 }
0x161c   :  { %v1019_v9 = vmul.f32 %v1671_v43, %v1017_v44 }
0x161e   :  { %v1052_v11 = vrot.slane %v1019_v9, 6 }
0x161f   :  { %v1039_v12 = vpop.permute.xlu0 %1038 }
0x1620   :  { %v1061_v19 = vsel %vm1060_vm6, %v1059_v0, %v1039_v12  ;;  %1053 = vrot.lane.b32.xlu1 %v1052_v11, %s1805_s27 }
0x1621   :  { %v1063_v23 = vsel %vm1062_vm7, %v1061_v19, %v1044_v15 }
0x1622   :  { %v1069_v49 = vpack.c.bf16 %v1063_v23, %v1063_v23 }
0x1623   :  { %v1027_v40 = vpop.permute.xlu0 %1026 }
0x1624   :  { %v1056_v50 = vsel %vm273_vm4, %v1022_v8, %v1027_v40  ;;  %1315 = vmatprep.mubr.bf16.mxu0 %v1069_v49 }
0x1625   :  { %v1057_v42 = vsel %vm177_vm2, %v1056_v50, %v1032_v6 }
0x1626   :  { %v1068_v51 = vpack.c.bf16 %v1057_v42, %v1057_v42 }
0x1627   :  { %v1049_v60 = vpop.permute.xlu0 %1048 }
0x1628   :  { %1316 = vmatmul.mubr.bf16.vlgmr.msra.gmra.mrb[16].mxu0 %v1068_v51  ;;  %v1065_v52 = vsel %vm1064_vm8, %v1044_v15, %v1049_v60 }
0x1692   :  { %v1054_v53 = vpop.permute.xlu1 %1053 }
0x1693   :  { %v1067_v54 = vsel %vm1066_vm9, %v1065_v52, %v1054_v53  ;;  %v1071_v55 = vpack.c.bf16 %v1054_v53, %v1054_v53 }
0x1694   :  { %v1070_v56 = vpack.c.bf16 %v1067_v54, %v1067_v54 }
0x1695   :  { %1463 = vmatprep.mubr.msk.bf16.mxu1 %vm1279_vm10, %v1071_v55 }
0x1696   :  { %1356 = vmatmul.mubr.bf16.vlgmr.msra.gmra.mrb[20].mxu1 %v1070_v56 }
0x16fb   :  { %v1480_v45 = vpop.f32.mrb[16].mxu0 }
0x16fc   :  { %v1481_v57 = vpop.f32.mrb[17].mxu0 }
0x16fd   :  { %v1482_v47 = vadd.f32 %v1481_v57, %v1480_v45  ;;  %v1483_v58 = vpop.f32.mrb[18].mxu0 }
0x16fe   :  { %v1484_v59 = vpop.f32.mrb[19].mxu0 }
0x16ff   :  { %v1318_v62 = vadd.f32 %v1482_v47, %v1437_v61 }
0x1769   :  { %v1357_v63 = vpop.f32.mrb[20].mxu1 }
0x176a   :  { %v1358_v2 = vadd.f32 %v1357_v63, %v1318_v62  ;;  %v1359_v3 = vpop.f32.mrb[21].mxu1 }
0x176b   :  { %v1360_v4 = vpop.f32.mrb[22].mxu1 }
0x176c   :  { %1363 = vst [vmem:[#allocation10] sm:$0x3] %v1358_v2  ;;  %v1361_v7 = vpop.f32.mrb[23].mxu1 }
0x176d   :  { %1771 = shalt.err (!%p1768_p8)
}
0x176e   :  { %s1772_s5 = scalar_lea.hbm %s2171_s6, 32 }
0x176f   :  { %p1773_p9 = scmp.ne.s32.totalorder %s2171_s6, %s1772_s5  ;;  %p1776_p10 = scmp.lt.u32.totalorder %s1772_s5, %s2171_s6 }
0x1771   :  { %p1778_p11 = pnand %p1776_p10, %p1773_p9 }
0x1773   :  { %1781 = shalt.err (!%p1778_p11)
}
0x1774   :  { %1373 = dma.vmem_to_hbm [thread:$0]  %s1371_s9, 32, %s2171_s6, [#allocation4]  }
0x1775   :  { %1788 = dma.done.wait [#allocation4], 32  }
0x1776   :  { %1789 = vsyncadd [#allocation4], 4294967264 }
0x1777   :  { %1377 = vsyncpa [#allocation3], 1 }
0x1778   :  { %1378 = vsyncpa [#allocation6], 1 }
0x1779   :  { %1379 = vsyncpa [#allocation9], 1 }
0x177a   :  { %1380 = vsyncpa [#allocation4], 1 }

</bundles_post_ra>
